<compile_context>
chip_gen: v6e
topology: v6e:2x2x1
jax: 0.10.0
libtpu: 0.0.40
codegen_flags: <defaults>
</compile_context>

<pallas_src>
import functools

import jax
import jax.numpy as jnp
from jax.experimental import pallas as pl
from jax.experimental.pallas import tpu as pltpu

BN_EPS = 1e-5
CPAD = 128          # padded channel count (real channels = 64): lane-dense
COUT = 64           # real channel count of every conv in this network
STEM_K = 7
STEM_KPAD = 8       # stem im2col contraction padded 7 -> 8
NBLK = 2            # two ResidualBlock(64, 64)


# ---------------------------------------------------------------------------
# Stem: Conv1d(1, 64, k=7, s=2, p=3) + BN(train) + ReLU  (one bf16 MXU matmul)
# ---------------------------------------------------------------------------
def _stem_kernel(x_ref, w_ref, g_ref, b_ref, o_ref, *, l_out, eps):
    bsz = x_ref.shape[0]
    cpad = w_ref.shape[1]
    m = bsz * l_out

    # im2col patches arrive pre-built (Cin=1, K=7 -> tiny); bf16 fed directly.
    xv = x_ref[...].reshape(m, x_ref.shape[2])              # (B*Lout, 8) bf16
    acc = jnp.dot(xv, w_ref[...], preferred_element_type=jnp.float32)

    mean = jnp.sum(acc, axis=0, keepdims=True) * (1.0 / m)
    var = jnp.sum(acc * acc, axis=0, keepdims=True) * (1.0 / m) - mean * mean
    scale = jax.lax.rsqrt(jnp.maximum(var, 0.0) + eps) * g_ref[...]
    y = jnp.maximum((acc - mean) * scale + b_ref[...], 0.0)

    # Direct slice stores: data rows plus explicit zero length-halos (no
    # concatenate copy).  Halo rows make the k=3 convs padding-free.
    zrow = jnp.zeros((bsz, 1, cpad), o_ref.dtype)
    o_ref[:, 0:1, :] = zrow
    o_ref[:, 1:1 + l_out, :] = y.reshape(bsz, l_out, cpad).astype(o_ref.dtype)
    o_ref[:, 1 + l_out:2 + l_out, :] = zrow


def stem_conv_bn(patches, w, gamma, beta, *, l_out):
    bsz = patches.shape[0]
    kern = functools.partial(_stem_kernel, l_out=l_out, eps=BN_EPS)
    return pl.pallas_call(
        kern,
        out_shape=jax.ShapeDtypeStruct((bsz, l_out + 2, CPAD), jnp.bfloat16),
        grid=(1,),
        in_specs=[
            pl.BlockSpec((bsz, l_out, STEM_KPAD), lambda i: (0, 0, 0)),
            pl.BlockSpec((STEM_KPAD, CPAD), lambda i: (0, 0)),
            pl.BlockSpec((1, CPAD), lambda i: (0, 0)),
            pl.BlockSpec((1, CPAD), lambda i: (0, 0)),
        ],
        out_specs=pl.BlockSpec((bsz, l_out + 2, CPAD), lambda i: (0, 0, 0)),
        compiler_params=pltpu.CompilerParams(
            dimension_semantics=("arbitrary",)),
    )(patches, w, gamma, beta)


# ---------------------------------------------------------------------------
# Both residual blocks in one kernel; grid iterates over blocks, the
# activation is carried in VMEM between them (flat halo'd layout).
# ---------------------------------------------------------------------------
def _blocks_kernel(h0_ref, w1_ref, g1_ref, b1_ref, w2_ref, g2_ref, b2_ref,
                   pool_ref, h_ref, h1_ref, *, l_out, eps):
    blk = pl.program_id(0)
    nblk = pl.num_programs(0)
    rows, cpad = h_ref.shape                 # rows = B*(l_out+2), flat layout
    l2 = l_out + 2
    bsz = rows // l2
    n = rows - 2                             # tap-aligned accumulator rows
    m = bsz * l_out                          # valid elements per channel (BN)

    @pl.when(blk == 0)
    def _load_carry():
        h_ref[...] = h0_ref[...]             # stem output -> VMEM carry

    # Row r of the accumulator is a real conv output iff (r mod l2) < l_out;
    # the remaining rows straddle a sample boundary (they read a zero halo of
    # the neighbouring sample) and are masked out of statistics and stores.
    r = jax.lax.broadcasted_iota(jnp.int32, (n, 1), 0)
    mask = ((r % l2) < l_out).astype(jnp.float32)

    def conv3(src_ref, w_ref):
        # k=3 conv: three contiguous sublane-offset bf16 slices of the flat
        # (rows, 128) ref feeding the MXU, accumulated in f32.  No im2col,
        # no reshape copies, no f32 upcast of the activations.
        acc = jnp.zeros((n, cpad), jnp.float32)
        for t in range(3):
            acc = acc + jnp.dot(src_ref[t:t + n, :], w_ref[0, t],
                                preferred_element_type=jnp.float32)
        return acc

    def batchnorm(acc, g_ref, b_ref):
        am = acc * mask
        mean = jnp.sum(am, axis=0, keepdims=True) * (1.0 / m)
        var = jnp.sum(am * acc, axis=0, keepdims=True) * (1.0 / m) - mean * mean
        scale = jax.lax.rsqrt(jnp.maximum(var, 0.0) + eps) * g_ref[0]
        return (acc - mean) * scale + b_ref[0]

    zrow = jnp.zeros((1, cpad), h1_ref.dtype)

    # conv1 + BN1 + ReLU -> mid activation, kept in VMEM only.
    y1 = jnp.maximum(batchnorm(conv3(h_ref, w1_ref), g1_ref, b1_ref), 0.0)
    h1_ref[0:1, :] = zrow
    h1_ref[1:1 + n, :] = (y1 * mask).astype(h1_ref.dtype)
    h1_ref[1 + n:2 + n, :] = zrow

    # conv2 + BN2 + residual + ReLU -> overwrite the carry (rows 0 and rows-1
    # are untouched and stay zero from the block input's halos).
    y2 = batchnorm(conv3(h1_ref, w2_ref), g2_ref, b2_ref)
    y2 = y2 + h_ref[1:1 + n, :].astype(jnp.float32)      # residual (ref slice)
    y2 = jnp.maximum(y2, 0.0) * mask
    h_ref[1:1 + n, :] = y2.astype(h_ref.dtype)

    # Fused global mean-pool on the last block: the final feature map never
    # reaches HBM, only the (B, 128) pooled features do.
    @pl.when(blk == nblk - 1)
    def _pool():
        zf = jnp.zeros((1, cpad), jnp.float32)
        full = jnp.concatenate([zf, y2, zf], axis=0).reshape(bsz, l2, cpad)
        pool_ref[...] = (jnp.sum(full, axis=1) * (1.0 / l_out)
                         ).astype(pool_ref.dtype)


def _vmem_limit_bytes(rows):
    # Carry + mid bf16 activations, double-buffered block weights, and a few
    # f32 (rows, 128) temporaries; clamp so it also fits v7x's 64 MiB physical
    # VMEM.  v5e's 16 MiB scoped default is too small at realistic L.
    act = rows * CPAD * 2
    wts = 2 * (2 * 3 * CPAD * CPAD * 2)
    est = 2 * act + wts + 6 * rows * CPAD * 4
    return int(min(max(32 << 20, 2 * est), 60 << 20))


def residual_blocks(h0_flat, w1, g1, b1, w2, g2, b2, *, l_out):
    rows = h0_flat.shape[0]
    bsz = rows // (l_out + 2)
    nblk = w1.shape[0]
    kern = functools.partial(_blocks_kernel, l_out=l_out, eps=BN_EPS)
    wspec = pl.BlockSpec((1, 3, CPAD, CPAD), lambda b: (b, 0, 0, 0))
    vspec = pl.BlockSpec((1, 1, CPAD), lambda b: (b, 0, 0))
    return pl.pallas_call(
        kern,
        out_shape=jax.ShapeDtypeStruct((bsz, CPAD), jnp.float32),
        grid=(nblk,),
        in_specs=[
            pl.BlockSpec((rows, CPAD), lambda b: (0, 0)),   # fetched once
            wspec, vspec, vspec, wspec, vspec, vspec,
        ],
        out_specs=pl.BlockSpec((bsz, CPAD), lambda b: (0, 0)),
        scratch_shapes=[pltpu.VMEM((rows, CPAD), jnp.bfloat16),   # carry h
                        pltpu.VMEM((rows, CPAD), jnp.bfloat16)],  # mid h1
        compiler_params=pltpu.CompilerParams(
            dimension_semantics=("arbitrary",),       # VMEM carry across blocks
            vmem_limit_bytes=_vmem_limit_bytes(rows)),
    )(h0_flat, w1, g1, b1, w2, g2, b2)


# ---------------------------------------------------------------------------
# Plain-JAX glue: stem im2col (Cin=1, tiny) and parameter packing
# ---------------------------------------------------------------------------
def stem_im2col(x):
    """(B, L) f32 -> (B, Lout, 8) bf16 patches for Conv1d(1,64,k=7,s=2,p=3)."""
    _, l = x.shape
    pad, k, stride = 3, STEM_K, 2
    lout = (l + 2 * pad - k) // stride + 1
    xp = jnp.pad(x, ((0, 0), (pad, pad)))
    idx = jnp.arange(lout)[:, None] * stride + jnp.arange(k)[None, :]
    patches = xp[:, idx]                                        # (B, Lout, 7)
    patches = jnp.pad(patches, ((0, 0), (0, 0), (0, STEM_KPAD - k)))
    return patches.astype(jnp.bfloat16), lout


def pack_vec(v):
    return jnp.zeros((1, CPAD), jnp.float32).at[0, :v.shape[0]].set(v)


def pack_stem_w(w):          # torch (64, 1, 7) -> (8, 128) bf16
    out = jnp.zeros((STEM_KPAD, CPAD), jnp.float32)
    out = out.at[:STEM_K, :COUT].set(w[:, 0, :].T)
    return out.astype(jnp.bfloat16)


def pack_conv3_w(w):         # torch (Cout, Cin, 3) -> (3, 128, 128) bf16
    cout, cin, k = w.shape
    out = jnp.zeros((k, CPAD, CPAD), jnp.float32)
    out = out.at[:, :cin, :cout].set(jnp.transpose(w, (2, 1, 0)))
    return out.astype(jnp.bfloat16)


def pack_params(p):
    blocks = p["blocks"]
    return {
        "stem_w": pack_stem_w(p["conv_w"]),
        "stem_g": pack_vec(p["bn_g"]), "stem_b": pack_vec(p["bn_b"]),
        "w1": jnp.stack([pack_conv3_w(b["c1_w"]) for b in blocks]),
        "g1": jnp.stack([pack_vec(b["bn1_g"]) for b in blocks]),
        "b1": jnp.stack([pack_vec(b["bn1_b"]) for b in blocks]),
        "w2": jnp.stack([pack_conv3_w(b["c2_w"]) for b in blocks]),
        "g2": jnp.stack([pack_vec(b["bn2_g"]) for b in blocks]),
        "b2": jnp.stack([pack_vec(b["bn2_b"]) for b in blocks]),
        "fc_w": p["fc_w"], "fc_b": p["fc_b"],
    }


def init_params(key, output_size):
    # Conv biases are intentionally omitted: a training-mode BatchNorm follows
    # every conv and its mean subtraction cancels a per-channel bias exactly.
    def nrm(k, shape, scale):
        return scale * jax.random.normal(k, shape, dtype=jnp.float32)

    keys = jax.random.split(key, 8)
    params = {
        "conv_w": nrm(keys[0], (COUT, 1, STEM_K), 0.3),
        "bn_g": 1.0 + nrm(keys[1], (COUT,), 0.05),
        "bn_b": nrm(keys[2], (COUT,), 0.05),
        "blocks": [],
        "fc_w": nrm(keys[3], (output_size, COUT), 0.1),
        "fc_b": nrm(keys[4], (output_size,), 0.05),
    }
    for i in range(NBLK):    # two ResidualBlock(64, 64)
        bk = jax.random.split(keys[5 + i], 6)
        params["blocks"].append({
            "c1_w": nrm(bk[0], (COUT, COUT, 3), 0.05),
            "bn1_g": 1.0 + nrm(bk[1], (COUT,), 0.05),
            "bn1_b": nrm(bk[2], (COUT,), 0.05),
            "c2_w": nrm(bk[3], (COUT, COUT, 3), 0.05),
            "bn2_g": 1.0 + nrm(bk[4], (COUT,), 0.05),
            "bn2_b": nrm(bk[5], (COUT,), 0.05),
        })
    return params


# ---------------------------------------------------------------------------
# Full forward pass (mirrors ResNet.forward)
# ---------------------------------------------------------------------------
def resnet_forward(x, packed):
    bsz = x.shape[0]
    patches, lout = stem_im2col(x)           # stem Conv1d(1,64,k=7,s=2,p=3)
    h0 = stem_conv_bn(patches, packed["stem_w"], packed["stem_g"],
                      packed["stem_b"], l_out=lout)     # (B, Lout+2, 128) bf16
    # Flatten to the halo'd 2-D layout (free reshape: merges leading dims).
    h0_flat = h0.reshape(bsz * (lout + 2), CPAD)
    pooled = residual_blocks(
        h0_flat, packed["w1"], packed["g1"], packed["b1"],
        packed["w2"], packed["g2"], packed["b2"], l_out=lout)   # (B, 128) f32
    # Tiny (B,64)@(64,out) FC: left to XLA (a Pallas kernel is pure overhead
    # at this size, per the performance review).
    return pooled[:, :COUT] @ packed["fc_w"].T + packed["fc_b"]


# ---------------------------------------------------------------------------
if __name__ == "__main__":
    B, INPUT_SIZE, OUTPUT_SIZE = 2, 16, 8
    key = jax.random.PRNGKey(0)
    kx, kp = jax.random.split(key)
    x = jax.random.normal(kx, (B, INPUT_SIZE), dtype=jnp.float32)
    params = init_params(kp, OUTPUT_SIZE)
    packed = pack_params(params)

    fwd = jax.jit(resnet_forward)
    out = fwd(x, packed)
    jax.block_until_ready(out)
    assert out.shape == (B, OUTPUT_SIZE)
    assert bool(jnp.all(jnp.isfinite(out)))
    print("KERNEL_OK")
</pallas_src>

<mosaic_0001>
module attributes {stable_mosaic.version = 11 : i64} {
  func.func @_blocks_kernel(%arg0: i32, %arg1: memref<20x128xbf16, #tpu.memory_space<vmem>>, %arg2: memref<1x3x128x128xbf16, #tpu.memory_space<vmem>>, %arg3: memref<1x1x128xf32, #tpu.memory_space<vmem>>, %arg4: memref<1x1x128xf32, #tpu.memory_space<vmem>>, %arg5: memref<1x3x128x128xbf16, #tpu.memory_space<vmem>>, %arg6: memref<1x1x128xf32, #tpu.memory_space<vmem>>, %arg7: memref<1x1x128xf32, #tpu.memory_space<vmem>>, %arg8: memref<2x128xf32, #tpu.memory_space<vmem>>, %arg9: memref<20x128xbf16, #tpu.memory_space<vmem>>, %arg10: memref<20x128xbf16, #tpu.memory_space<vmem>>) attributes {dimension_semantics = [#tpu.dimension_semantics<arbitrary>], iteration_bounds = array<i64: 2>, scalar_prefetch = 0 : i64, scratch_operands = 2 : i64, tpu.core_type = #tpu.core_type<tc>, window_params = [{pipeline_mode = #tpu.pipeline_mode<synchronous>, transform_indices = @transform_0, window_bounds = array<i64: 20, 128>}, {transform_indices = @transform_1, window_bounds = array<i64: 1, 3, 128, 128>}, {transform_indices = @transform_2, window_bounds = array<i64: 1, 1, 128>}, {transform_indices = @transform_3, window_bounds = array<i64: 1, 1, 128>}, {transform_indices = @transform_4, window_bounds = array<i64: 1, 3, 128, 128>}, {transform_indices = @transform_5, window_bounds = array<i64: 1, 1, 128>}, {transform_indices = @transform_6, window_bounds = array<i64: 1, 1, 128>}, {pipeline_mode = #tpu.pipeline_mode<synchronous>, transform_indices = @transform_7, window_bounds = array<i64: 2, 128>}]} {
    %c0_i32 = arith.constant 0 : i32
    %0 = arith.cmpi eq, %arg0, %c0_i32 : i32
    %1 = arith.extui %0 : i1 to i32
    %c0_i32_0 = arith.constant 0 : i32
    %2 = arith.cmpi ne, %1, %c0_i32_0 : i32
    scf.if %2 {
      %c0_83 = arith.constant 0 : index
      %c0_84 = arith.constant 0 : index
      %135 = vector.load %arg1[%c0_83, %c0_84] : memref<20x128xbf16, #tpu.memory_space<vmem>>, vector<20x128xbf16>
      %c0_85 = arith.constant 0 : index
      %c0_86 = arith.constant 0 : index
      %136 = vector.load %arg9[%c0_85, %c0_86] : memref<20x128xbf16, #tpu.memory_space<vmem>>, vector<20x128xbf16>
      tpu.vector_store %arg9[%c0_85, %c0_86], %135 {strides = array<i32>} : memref<20x128xbf16, #tpu.memory_space<vmem>>, vector<20x128xbf16>,
    } else {
    }
    %3 = tpu.iota {dimensions = array<i32: 0>} : vector<18x1xi32>
    %c10_i32 = arith.constant 10 : i32
    %c0_i32_1 = arith.constant 0 : i32
    %4 = arith.cmpi eq, %c10_i32, %c0_i32_1 : i32
    %c1_i32 = arith.constant 1 : i32
    %5 = arith.select %4, %c1_i32, %c10_i32 : i32
    %6 = vector.broadcast %5 : i32 to vector<18x1xi32>
    %7 = arith.remsi %3, %6 : vector<18x1xi32>
    %c0_i32_2 = arith.constant 0 : i32
    %8 = vector.broadcast %c0_i32_2 : i32 to vector<18x1xi32>
    %9 = arith.cmpi ne, %7, %8 : vector<18x1xi32>
    %c0_i32_3 = arith.constant 0 : i32
    %10 = vector.broadcast %c0_i32_3 : i32 to vector<18x1xi32>
    %11 = arith.cmpi slt, %7, %10 : vector<18x1xi32>
    %c0_i32_4 = arith.constant 0 : i32
    %12 = arith.cmpi slt, %5, %c0_i32_4 : i32
    %13 = vector.broadcast %12 : i1 to vector<18x1xi1>
    %14 = vector.broadcast %13 : vector<18x1xi1> to vector<18x1xi1>
    %15 = arith.xori %11, %14 : vector<18x1xi1>
    %16 = arith.andi %15, %9 : vector<18x1xi1>
    %17 = vector.broadcast %5 : i32 to vector<18x1xi32>
    %18 = arith.addi %7, %17 : vector<18x1xi32>
    %19 = arith.select %16, %18, %7 : vector<18x1xi1>, vector<18x1xi32>
    %c8_i32 = arith.constant 8 : i32
    %20 = vector.broadcast %c8_i32 : i32 to vector<18x1xi32>
    %21 = arith.cmpi slt, %19, %20 : vector<18x1xi32>
    %22 = arith.extui %21 : vector<18x1xi1> to vector<18x1xi32>
    %23 = arith.sitofp %22 : vector<18x1xi32> to vector<18x1xf32>
    %cst = arith.constant 0.000000e+00 : bf16
    %24 = vector.broadcast %cst : bf16 to vector<1x128xbf16>
    %cst_5 = arith.constant 0.000000e+00 : f32
    %25 = vector.broadcast %cst_5 : f32 to vector<18x128xf32>
    %c0 = arith.constant 0 : index
    %c0_6 = arith.constant 0 : index
    %26 = vector.load %arg9[%c0, %c0_6] : memref<20x128xbf16, #tpu.memory_space<vmem>>, vector<18x128xbf16>
    %c0_7 = arith.constant 0 : index
    %c0_8 = arith.constant 0 : index
    %c0_9 = arith.constant 0 : index
    %c0_10 = arith.constant 0 : index
    %27 = vector.load %arg2[%c0_7, %c0_8, %c0_9, %c0_10] : memref<1x3x128x128xbf16, #tpu.memory_space<vmem>>, vector<1x1x128x128xbf16>
    %28 = vector.shape_cast %27 : vector<1x1x128x128xbf16> to vector<128x128xbf16>
    %cst_11 = arith.constant dense<0.000000e+00> : vector<18x128xf32>
    %29 = tpu.matmul %26, %28, %cst_11 {dimension_numbers = #tpu.dot_dimension_numbers<[1], [0], [0], [1], [0, 0, 1, 1], [], []>} : vector<18x128xbf16>, vector<128x128xbf16>, vector<18x128xf32> -> vector<18x128xf32>
    %30 = arith.addf %25, %29 : vector<18x128xf32>
    %c1 = arith.constant 1 : index
    %c0_12 = arith.constant 0 : index
    %31 = vector.load %arg9[%c1, %c0_12] : memref<20x128xbf16, #tpu.memory_space<vmem>>, vector<18x128xbf16>
    %c0_13 = arith.constant 0 : index
    %c1_14 = arith.constant 1 : index
    %c0_15 = arith.constant 0 : index
    %c0_16 = arith.constant 0 : index
    %32 = vector.load %arg2[%c0_13, %c1_14, %c0_15, %c0_16] : memref<1x3x128x128xbf16, #tpu.memory_space<vmem>>, vector<1x1x128x128xbf16>
    %33 = vector.shape_cast %32 : vector<1x1x128x128xbf16> to vector<128x128xbf16>
    %cst_17 = arith.constant dense<0.000000e+00> : vector<18x128xf32>
    %34 = tpu.matmul %31, %33, %cst_17 {dimension_numbers = #tpu.dot_dimension_numbers<[1], [0], [0], [1], [0, 0, 1, 1], [], []>} : vector<18x128xbf16>, vector<128x128xbf16>, vector<18x128xf32> -> vector<18x128xf32>
    %35 = arith.addf %30, %34 : vector<18x128xf32>
    %c2 = arith.constant 2 : index
    %c0_18 = arith.constant 0 : index
    %36 = vector.load %arg9[%c2, %c0_18] : memref<20x128xbf16, #tpu.memory_space<vmem>>, vector<18x128xbf16>
    %c0_19 = arith.constant 0 : index
    %c2_20 = arith.constant 2 : index
    %c0_21 = arith.constant 0 : index
    %c0_22 = arith.constant 0 : index
    %37 = vector.load %arg2[%c0_19, %c2_20, %c0_21, %c0_22] : memref<1x3x128x128xbf16, #tpu.memory_space<vmem>>, vector<1x1x128x128xbf16>
    %38 = vector.shape_cast %37 : vector<1x1x128x128xbf16> to vector<128x128xbf16>
    %cst_23 = arith.constant dense<0.000000e+00> : vector<18x128xf32>
    %39 = tpu.matmul %36, %38, %cst_23 {dimension_numbers = #tpu.dot_dimension_numbers<[1], [0], [0], [1], [0, 0, 1, 1], [], []>} : vector<18x128xbf16>, vector<128x128xbf16>, vector<18x128xf32> -> vector<18x128xf32>
    %40 = arith.addf %35, %39 : vector<18x128xf32>
    %41 = vector.broadcast %23 : vector<18x1xf32> to vector<18x128xf32>
    %42 = arith.mulf %40, %41 : vector<18x128xf32>
    %cst_24 = arith.constant dense<0.000000e+00> : vector<128xf32>
    %43 = vector.multi_reduction <add>, %42, %cst_24 [0] : vector<18x128xf32> to vector<128xf32>
    %44 = vector.shape_cast %43 : vector<128xf32> to vector<1x128xf32>
    %cst_25 = arith.constant 6.250000e-02 : f32
    %45 = vector.broadcast %cst_25 : f32 to vector<1x128xf32>
    %46 = arith.mulf %44, %45 : vector<1x128xf32>
    %47 = arith.mulf %42, %40 : vector<18x128xf32>
    %cst_26 = arith.constant dense<0.000000e+00> : vector<128xf32>
    %48 = vector.multi_reduction <add>, %47, %cst_26 [0] : vector<18x128xf32> to vector<128xf32>
    %49 = vector.shape_cast %48 : vector<128xf32> to vector<1x128xf32>
    %cst_27 = arith.constant 6.250000e-02 : f32
    %50 = vector.broadcast %cst_27 : f32 to vector<1x128xf32>
    %51 = arith.mulf %49, %50 : vector<1x128xf32>
    %52 = arith.mulf %46, %46 : vector<1x128xf32>
    %53 = arith.subf %51, %52 : vector<1x128xf32>
    %cst_28 = arith.constant 0.000000e+00 : f32
    %54 = vector.broadcast %cst_28 : f32 to vector<1x128xf32>
    %55 = arith.maximumf %53, %54 : vector<1x128xf32>
    %cst_29 = arith.constant 9.99999974E-6 : f32
    %56 = vector.broadcast %cst_29 : f32 to vector<1x128xf32>
    %57 = arith.addf %55, %56 : vector<1x128xf32>
    %58 = math.rsqrt %57 : vector<1x128xf32>
    %c0_30 = arith.constant 0 : index
    %c0_31 = arith.constant 0 : index
    %c0_32 = arith.constant 0 : index
    %59 = vector.load %arg3[%c0_30, %c0_31, %c0_32] : memref<1x1x128xf32, #tpu.memory_space<vmem>>, vector<1x1x128xf32>
    %60 = vector.shape_cast %59 : vector<1x1x128xf32> to vector<1x128xf32>
    %61 = arith.mulf %58, %60 : vector<1x128xf32>
    %62 = vector.broadcast %46 : vector<1x128xf32> to vector<18x128xf32>
    %63 = arith.subf %40, %62 : vector<18x128xf32>
    %64 = vector.broadcast %61 : vector<1x128xf32> to vector<18x128xf32>
    %65 = arith.mulf %63, %64 : vector<18x128xf32>
    %c0_33 = arith.constant 0 : index
    %c0_34 = arith.constant 0 : index
    %c0_35 = arith.constant 0 : index
    %66 = vector.load %arg4[%c0_33, %c0_34, %c0_35] : memref<1x1x128xf32, #tpu.memory_space<vmem>>, vector<1x1x128xf32>
    %67 = vector.shape_cast %66 : vector<1x1x128xf32> to vector<1x128xf32>
    %68 = vector.broadcast %67 : vector<1x128xf32> to vector<18x128xf32>
    %69 = arith.addf %65, %68 : vector<18x128xf32>
    %cst_36 = arith.constant 0.000000e+00 : f32
    %70 = vector.broadcast %cst_36 : f32 to vector<18x128xf32>
    %71 = arith.maximumf %69, %70 : vector<18x128xf32>
    %c0_37 = arith.constant 0 : index
    %c0_38 = arith.constant 0 : index
    %72 = vector.load %arg10[%c0_37, %c0_38] : memref<20x128xbf16, #tpu.memory_space<vmem>>, vector<1x128xbf16>
    tpu.vector_store %arg10[%c0_37, %c0_38], %24 {strides = array<i32>} : memref<20x128xbf16, #tpu.memory_space<vmem>>, vector<1x128xbf16>,
    %73 = vector.broadcast %23 : vector<18x1xf32> to vector<18x128xf32>
    %74 = arith.mulf %71, %73 : vector<18x128xf32>
    %75 = arith.truncf %74 : vector<18x128xf32> to vector<18x128xbf16>
    %c1_39 = arith.constant 1 : index
    %c0_40 = arith.constant 0 : index
    %76 = vector.load %arg10[%c1_39, %c0_40] : memref<20x128xbf16, #tpu.memory_space<vmem>>, vector<18x128xbf16>
    tpu.vector_store %arg10[%c1_39, %c0_40], %75 {strides = array<i32>} : memref<20x128xbf16, #tpu.memory_space<vmem>>, vector<18x128xbf16>,
    %c19 = arith.constant 19 : index
    %c0_41 = arith.constant 0 : index
    %77 = vector.load %arg10[%c19, %c0_41] : memref<20x128xbf16, #tpu.memory_space<vmem>>, vector<1x128xbf16>
    tpu.vector_store %arg10[%c19, %c0_41], %24 {strides = array<i32>} : memref<20x128xbf16, #tpu.memory_space<vmem>>, vector<1x128xbf16>,
    %cst_42 = arith.constant 0.000000e+00 : f32
    %78 = vector.broadcast %cst_42 : f32 to vector<18x128xf32>
    %c0_43 = arith.constant 0 : index
    %c0_44 = arith.constant 0 : index
    %79 = vector.load %arg10[%c0_43, %c0_44] : memref<20x128xbf16, #tpu.memory_space<vmem>>, vector<18x128xbf16>
    %c0_45 = arith.constant 0 : index
    %c0_46 = arith.constant 0 : index
    %c0_47 = arith.constant 0 : index
    %c0_48 = arith.constant 0 : index
    %80 = vector.load %arg5[%c0_45, %c0_46, %c0_47, %c0_48] : memref<1x3x128x128xbf16, #tpu.memory_space<vmem>>, vector<1x1x128x128xbf16>
    %81 = vector.shape_cast %80 : vector<1x1x128x128xbf16> to vector<128x128xbf16>
    %cst_49 = arith.constant dense<0.000000e+00> : vector<18x128xf32>
    %82 = tpu.matmul %79, %81, %cst_49 {dimension_numbers = #tpu.dot_dimension_numbers<[1], [0], [0], [1], [0, 0, 1, 1], [], []>} : vector<18x128xbf16>, vector<128x128xbf16>, vector<18x128xf32> -> vector<18x128xf32>
    %83 = arith.addf %78, %82 : vector<18x128xf32>
    %c1_50 = arith.constant 1 : index
    %c0_51 = arith.constant 0 : index
    %84 = vector.load %arg10[%c1_50, %c0_51] : memref<20x128xbf16, #tpu.memory_space<vmem>>, vector<18x128xbf16>
    %c0_52 = arith.constant 0 : index
    %c1_53 = arith.constant 1 : index
    %c0_54 = arith.constant 0 : index
    %c0_55 = arith.constant 0 : index
    %85 = vector.load %arg5[%c0_52, %c1_53, %c0_54, %c0_55] : memref<1x3x128x128xbf16, #tpu.memory_space<vmem>>, vector<1x1x128x128xbf16>
    %86 = vector.shape_cast %85 : vector<1x1x128x128xbf16> to vector<128x128xbf16>
    %cst_56 = arith.constant dense<0.000000e+00> : vector<18x128xf32>
    %87 = tpu.matmul %84, %86, %cst_56 {dimension_numbers = #tpu.dot_dimension_numbers<[1], [0], [0], [1], [0, 0, 1, 1], [], []>} : vector<18x128xbf16>, vector<128x128xbf16>, vector<18x128xf32> -> vector<18x128xf32>
    %88 = arith.addf %83, %87 : vector<18x128xf32>
    %c2_57 = arith.constant 2 : index
    %c0_58 = arith.constant 0 : index
    %89 = vector.load %arg10[%c2_57, %c0_58] : memref<20x128xbf16, #tpu.memory_space<vmem>>, vector<18x128xbf16>
    %c0_59 = arith.constant 0 : index
    %c2_60 = arith.constant 2 : index
    %c0_61 = arith.constant 0 : index
    %c0_62 = arith.constant 0 : index
    %90 = vector.load %arg5[%c0_59, %c2_60, %c0_61, %c0_62] : memref<1x3x128x128xbf16, #tpu.memory_space<vmem>>, vector<1x1x128x128xbf16>
    %91 = vector.shape_cast %90 : vector<1x1x128x128xbf16> to vector<128x128xbf16>
    %cst_63 = arith.constant dense<0.000000e+00> : vector<18x128xf32>
    %92 = tpu.matmul %89, %91, %cst_63 {dimension_numbers = #tpu.dot_dimension_numbers<[1], [0], [0], [1], [0, 0, 1, 1], [], []>} : vector<18x128xbf16>, vector<128x128xbf16>, vector<18x128xf32> -> vector<18x128xf32>
    %93 = arith.addf %88, %92 : vector<18x128xf32>
    %94 = vector.broadcast %23 : vector<18x1xf32> to vector<18x128xf32>
    %95 = arith.mulf %93, %94 : vector<18x128xf32>
    %cst_64 = arith.constant dense<0.000000e+00> : vector<128xf32>
    %96 = vector.multi_reduction <add>, %95, %cst_64 [0] : vector<18x128xf32> to vector<128xf32>
    %97 = vector.shape_cast %96 : vector<128xf32> to vector<1x128xf32>
    %cst_65 = arith.constant 6.250000e-02 : f32
    %98 = vector.broadcast %cst_65 : f32 to vector<1x128xf32>
    %99 = arith.mulf %97, %98 : vector<1x128xf32>
    %100 = arith.mulf %95, %93 : vector<18x128xf32>
    %cst_66 = arith.constant dense<0.000000e+00> : vector<128xf32>
    %101 = vector.multi_reduction <add>, %100, %cst_66 [0] : vector<18x128xf32> to vector<128xf32>
    %102 = vector.shape_cast %101 : vector<128xf32> to vector<1x128xf32>
    %cst_67 = arith.constant 6.250000e-02 : f32
    %103 = vector.broadcast %cst_67 : f32 to vector<1x128xf32>
    %104 = arith.mulf %102, %103 : vector<1x128xf32>
    %105 = arith.mulf %99, %99 : vector<1x128xf32>
    %106 = arith.subf %104, %105 : vector<1x128xf32>
    %cst_68 = arith.constant 0.000000e+00 : f32
    %107 = vector.broadcast %cst_68 : f32 to vector<1x128xf32>
    %108 = arith.maximumf %106, %107 : vector<1x128xf32>
    %cst_69 = arith.constant 9.99999974E-6 : f32
    %109 = vector.broadcast %cst_69 : f32 to vector<1x128xf32>
    %110 = arith.addf %108, %109 : vector<1x128xf32>
    %111 = math.rsqrt %110 : vector<1x128xf32>
    %c0_70 = arith.constant 0 : index
    %c0_71 = arith.constant 0 : index
    %c0_72 = arith.constant 0 : index
    %112 = vector.load %arg6[%c0_70, %c0_71, %c0_72] : memref<1x1x128xf32, #tpu.memory_space<vmem>>, vector<1x1x128xf32>
    %113 = vector.shape_cast %112 : vector<1x1x128xf32> to vector<1x128xf32>
    %114 = arith.mulf %111, %113 : vector<1x128xf32>
    %115 = vector.broadcast %99 : vector<1x128xf32> to vector<18x128xf32>
    %116 = arith.subf %93, %115 : vector<18x128xf32>
    %117 = vector.broadcast %114 : vector<1x128xf32> to vector<18x128xf32>
    %118 = arith.mulf %116, %117 : vector<18x128xf32>
    %c0_73 = arith.constant 0 : index
    %c0_74 = arith.constant 0 : index
    %c0_75 = arith.constant 0 : index
    %119 = vector.load %arg7[%c0_73, %c0_74, %c0_75] : memref<1x1x128xf32, #tpu.memory_space<vmem>>, vector<1x1x128xf32>
    %120 = vector.shape_cast %119 : vector<1x1x128xf32> to vector<1x128xf32>
    %121 = vector.broadcast %120 : vector<1x128xf32> to vector<18x128xf32>
    %122 = arith.addf %118, %121 : vector<18x128xf32>
    %c1_76 = arith.constant 1 : index
    %c0_77 = arith.constant 0 : index
    %123 = vector.load %arg9[%c1_76, %c0_77] : memref<20x128xbf16, #tpu.memory_space<vmem>>, vector<18x128xbf16>
    %124 = arith.extf %123 : vector<18x128xbf16> to vector<18x128xf32>
    %125 = arith.addf %122, %124 : vector<18x128xf32>
    %cst_78 = arith.constant 0.000000e+00 : f32
    %126 = vector.broadcast %cst_78 : f32 to vector<18x128xf32>
    %127 = arith.maximumf %125, %126 : vector<18x128xf32>
    %128 = vector.broadcast %23 : vector<18x1xf32> to vector<18x128xf32>
    %129 = arith.mulf %127, %128 : vector<18x128xf32>
    %130 = arith.truncf %129 : vector<18x128xf32> to vector<18x128xbf16>
    %c1_79 = arith.constant 1 : index
    %c0_80 = arith.constant 0 : index
    %131 = vector.load %arg9[%c1_79, %c0_80] : memref<20x128xbf16, #tpu.memory_space<vmem>>, vector<18x128xbf16>
    tpu.vector_store %arg9[%c1_79, %c0_80], %130 {strides = array<i32>} : memref<20x128xbf16, #tpu.memory_space<vmem>>, vector<18x128xbf16>,
    %c1_i32_81 = arith.constant 1 : i32
    %132 = arith.cmpi eq, %arg0, %c1_i32_81 : i32
    %133 = arith.extui %132 : i1 to i32
    %c0_i32_82 = arith.constant 0 : i32
    %134 = arith.cmpi ne, %133, %c0_i32_82 : i32
    scf.if %134 {
      %cst_83 = arith.constant 0.000000e+00 : f32
      %135 = vector.broadcast %cst_83 : f32 to vector<1x128xf32>
      %136 = tpu.concatenate %135, %129, %135 in 0 : vector<1x128xf32>, vector<18x128xf32>, vector<1x128xf32> -> vector<20x128xf32>
      %137 = vector.shape_cast %136 : vector<20x128xf32> to vector<2x10x128xf32>
      %cst_84 = arith.constant dense<0.000000e+00> : vector<2x128xf32>
      %138 = vector.multi_reduction <add>, %137, %cst_84 [1] : vector<2x10x128xf32> to vector<2x128xf32>
      %cst_85 = arith.constant 1.250000e-01 : f32
      %139 = vector.broadcast %cst_85 : f32 to vector<2x128xf32>
      %140 = arith.mulf %138, %139 : vector<2x128xf32>
      %c0_86 = arith.constant 0 : index
      %c0_87 = arith.constant 0 : index
      %141 = vector.load %arg8[%c0_86, %c0_87] : memref<2x128xf32, #tpu.memory_space<vmem>>, vector<2x128xf32>
      tpu.vector_store %arg8[%c0_86, %c0_87], %140 {strides = array<i32>} : memref<2x128xf32, #tpu.memory_space<vmem>>, vector<2x128xf32>,
    } else {
    }
    return
  }
  func.func @transform_0(%arg0: i32) -> (i32, i32) {
    %c0_i32 = arith.constant 0 : i32
    %c0_i32_0 = arith.constant 0 : i32
    %c0_i32_1 = arith.constant 0 : i32
    return %c0_i32, %c0_i32_0 : i32, i32
  }
  func.func @transform_1(%arg0: i32) -> (i32, i32, i32, i32) {
    %c0_i32 = arith.constant 0 : i32
    %c0_i32_0 = arith.constant 0 : i32
    %c0_i32_1 = arith.constant 0 : i32
    %c0_i32_2 = arith.constant 0 : i32
    return %arg0, %c0_i32, %c0_i32_0, %c0_i32_1 : i32, i32, i32, i32
  }
  func.func @transform_2(%arg0: i32) -> (i32, i32, i32) {
    %c0_i32 = arith.constant 0 : i32
    %c0_i32_0 = arith.constant 0 : i32
    %c0_i32_1 = arith.constant 0 : i32
    return %arg0, %c0_i32, %c0_i32_0 : i32, i32, i32
  }
  func.func @transform_3(%arg0: i32) -> (i32, i32, i32) {
    %c0_i32 = arith.constant 0 : i32
    %c0_i32_0 = arith.constant 0 : i32
    %c0_i32_1 = arith.constant 0 : i32
    return %arg0, %c0_i32, %c0_i32_0 : i32, i32, i32
  }
  func.func @transform_4(%arg0: i32) -> (i32, i32, i32, i32) {
    %c0_i32 = arith.constant 0 : i32
    %c0_i32_0 = arith.constant 0 : i32
    %c0_i32_1 = arith.constant 0 : i32
    %c0_i32_2 = arith.constant 0 : i32
    return %arg0, %c0_i32, %c0_i32_0, %c0_i32_1 : i32, i32, i32, i32
  }
  func.func @transform_5(%arg0: i32) -> (i32, i32, i32) {
    %c0_i32 = arith.constant 0 : i32
    %c0_i32_0 = arith.constant 0 : i32
    %c0_i32_1 = arith.constant 0 : i32
    return %arg0, %c0_i32, %c0_i32_0 : i32, i32, i32
  }
  func.func @transform_6(%arg0: i32) -> (i32, i32, i32) {
    %c0_i32 = arith.constant 0 : i32
    %c0_i32_0 = arith.constant 0 : i32
    %c0_i32_1 = arith.constant 0 : i32
    return %arg0, %c0_i32, %c0_i32_0 : i32, i32, i32
  }
  func.func @transform_7(%arg0: i32) -> (i32, i32) {
    %c0_i32 = arith.constant 0 : i32
    %c0_i32_0 = arith.constant 0 : i32
    %c0_i32_1 = arith.constant 0 : i32
    return %c0_i32, %c0_i32_0 : i32, i32
  }
}

module attributes {stable_mosaic.version = 11 : i64} {
  func.func @_stem_kernel(%arg0: i32, %arg1: memref<2x8x8xbf16, #tpu.memory_space<vmem>>, %arg2: memref<8x128xbf16, #tpu.memory_space<vmem>>, %arg3: memref<1x128xf32, #tpu.memory_space<vmem>>, %arg4: memref<1x128xf32, #tpu.memory_space<vmem>>, %arg5: memref<2x10x128xbf16, #tpu.memory_space<vmem>>) attributes {dimension_semantics = [#tpu.dimension_semantics<arbitrary>], iteration_bounds = array<i64: 1>, scalar_prefetch = 0 : i64, scratch_operands = 0 : i64, tpu.core_type = #tpu.core_type<tc>, window_params = [{pipeline_mode = #tpu.pipeline_mode<synchronous>, transform_indices = @transform_0, window_bounds = array<i64: 2, 8, 8>}, {pipeline_mode = #tpu.pipeline_mode<synchronous>, transform_indices = @transform_1, window_bounds = array<i64: 8, 128>}, {pipeline_mode = #tpu.pipeline_mode<synchronous>, transform_indices = @transform_2, window_bounds = array<i64: 1, 128>}, {pipeline_mode = #tpu.pipeline_mode<synchronous>, transform_indices = @transform_3, window_bounds = array<i64: 1, 128>}, {pipeline_mode = #tpu.pipeline_mode<synchronous>, transform_indices = @transform_4, window_bounds = array<i64: 2, 10, 128>}]} {
    %c0 = arith.constant 0 : index
    %c0_0 = arith.constant 0 : index
    %c0_1 = arith.constant 0 : index
    %0 = vector.load %arg1[%c0, %c0_0, %c0_1] : memref<2x8x8xbf16, #tpu.memory_space<vmem>>, vector<2x8x8xbf16>
    %1 = vector.shape_cast %0 : vector<2x8x8xbf16> to vector<16x8xbf16>
    %c0_2 = arith.constant 0 : index
    %c0_3 = arith.constant 0 : index
    %2 = vector.load %arg2[%c0_2, %c0_3] : memref<8x128xbf16, #tpu.memory_space<vmem>>, vector<8x128xbf16>
    %cst = arith.constant dense<0.000000e+00> : vector<16x128xf32>
    %3 = tpu.matmul %1, %2, %cst {dimension_numbers = #tpu.dot_dimension_numbers<[1], [0], [0], [1], [0, 0, 1, 1], [], []>} : vector<16x8xbf16>, vector<8x128xbf16>, vector<16x128xf32> -> vector<16x128xf32>
    %cst_4 = arith.constant dense<0.000000e+00> : vector<128xf32>
    %4 = vector.multi_reduction <add>, %3, %cst_4 [0] : vector<16x128xf32> to vector<128xf32>
    %5 = vector.shape_cast %4 : vector<128xf32> to vector<1x128xf32>
    %cst_5 = arith.constant 6.250000e-02 : f32
    %6 = vector.broadcast %cst_5 : f32 to vector<1x128xf32>
    %7 = arith.mulf %5, %6 : vector<1x128xf32>
    %8 = arith.mulf %3, %3 : vector<16x128xf32>
    %cst_6 = arith.constant dense<0.000000e+00> : vector<128xf32>
    %9 = vector.multi_reduction <add>, %8, %cst_6 [0] : vector<16x128xf32> to vector<128xf32>
    %10 = vector.shape_cast %9 : vector<128xf32> to vector<1x128xf32>
    %cst_7 = arith.constant 6.250000e-02 : f32
    %11 = vector.broadcast %cst_7 : f32 to vector<1x128xf32>
    %12 = arith.mulf %10, %11 : vector<1x128xf32>
    %13 = arith.mulf %7, %7 : vector<1x128xf32>
    %14 = arith.subf %12, %13 : vector<1x128xf32>
    %cst_8 = arith.constant 0.000000e+00 : f32
    %15 = vector.broadcast %cst_8 : f32 to vector<1x128xf32>
    %16 = arith.maximumf %14, %15 : vector<1x128xf32>
    %cst_9 = arith.constant 9.99999974E-6 : f32
    %17 = vector.broadcast %cst_9 : f32 to vector<1x128xf32>
    %18 = arith.addf %16, %17 : vector<1x128xf32>
    %19 = math.rsqrt %18 : vector<1x128xf32>
    %c0_10 = arith.constant 0 : index
    %c0_11 = arith.constant 0 : index
    %20 = vector.load %arg3[%c0_10, %c0_11] : memref<1x128xf32, #tpu.memory_space<vmem>>, vector<1x128xf32>
    %21 = arith.mulf %19, %20 : vector<1x128xf32>
    %22 = vector.broadcast %7 : vector<1x128xf32> to vector<16x128xf32>
    %23 = arith.subf %3, %22 : vector<16x128xf32>
    %24 = vector.broadcast %21 : vector<1x128xf32> to vector<16x128xf32>
    %25 = arith.mulf %23, %24 : vector<16x128xf32>
    %c0_12 = arith.constant 0 : index
    %c0_13 = arith.constant 0 : index
    %26 = vector.load %arg4[%c0_12, %c0_13] : memref<1x128xf32, #tpu.memory_space<vmem>>, vector<1x128xf32>
    %27 = vector.broadcast %26 : vector<1x128xf32> to vector<16x128xf32>
    %28 = arith.addf %25, %27 : vector<16x128xf32>
    %cst_14 = arith.constant 0.000000e+00 : f32
    %29 = vector.broadcast %cst_14 : f32 to vector<16x128xf32>
    %30 = arith.maximumf %28, %29 : vector<16x128xf32>
    %cst_15 = arith.constant 0.000000e+00 : bf16
    %31 = vector.broadcast %cst_15 : bf16 to vector<2x1x128xbf16>
    %c0_16 = arith.constant 0 : index
    %c0_17 = arith.constant 0 : index
    %c0_18 = arith.constant 0 : index
    %32 = vector.load %arg5[%c0_16, %c0_17, %c0_18] : memref<2x10x128xbf16, #tpu.memory_space<vmem>>, vector<2x1x128xbf16>
    tpu.vector_store %arg5[%c0_16, %c0_17, %c0_18], %31 {strides = array<i32>} : memref<2x10x128xbf16, #tpu.memory_space<vmem>>, vector<2x1x128xbf16>,
    %33 = vector.shape_cast %30 : vector<16x128xf32> to vector<2x8x128xf32>
    %34 = arith.truncf %33 : vector<2x8x128xf32> to vector<2x8x128xbf16>
    %c0_19 = arith.constant 0 : index
    %c1 = arith.constant 1 : index
    %c0_20 = arith.constant 0 : index
    %35 = vector.load %arg5[%c0_19, %c1, %c0_20] : memref<2x10x128xbf16, #tpu.memory_space<vmem>>, vector<2x8x128xbf16>
    tpu.vector_store %arg5[%c0_19, %c1, %c0_20], %34 {strides = array<i32>} : memref<2x10x128xbf16, #tpu.memory_space<vmem>>, vector<2x8x128xbf16>,
    %c0_21 = arith.constant 0 : index
    %c9 = arith.constant 9 : index
    %c0_22 = arith.constant 0 : index
    %36 = vector.load %arg5[%c0_21, %c9, %c0_22] : memref<2x10x128xbf16, #tpu.memory_space<vmem>>, vector<2x1x128xbf16>
    tpu.vector_store %arg5[%c0_21, %c9, %c0_22], %31 {strides = array<i32>} : memref<2x10x128xbf16, #tpu.memory_space<vmem>>, vector<2x1x128xbf16>,
    return
  }
  func.func @transform_0(%arg0: i32) -> (i32, i32, i32) {
    %c0_i32 = arith.constant 0 : i32
    %c0_i32_0 = arith.constant 0 : i32
    %c0_i32_1 = arith.constant 0 : i32
    %c0_i32_2 = arith.constant 0 : i32
    return %c0_i32, %c0_i32_0, %c0_i32_1 : i32, i32, i32
  }
  func.func @transform_1(%arg0: i32) -> (i32, i32) {
    %c0_i32 = arith.constant 0 : i32
    %c0_i32_0 = arith.constant 0 : i32
    %c0_i32_1 = arith.constant 0 : i32
    return %c0_i32, %c0_i32_0 : i32, i32
  }
  func.func @transform_2(%arg0: i32) -> (i32, i32) {
    %c0_i32 = arith.constant 0 : i32
    %c0_i32_0 = arith.constant 0 : i32
    %c0_i32_1 = arith.constant 0 : i32
    return %c0_i32, %c0_i32_0 : i32, i32
  }
  func.func @transform_3(%arg0: i32) -> (i32, i32) {
    %c0_i32 = arith.constant 0 : i32
    %c0_i32_0 = arith.constant 0 : i32
    %c0_i32_1 = arith.constant 0 : i32
    return %c0_i32, %c0_i32_0 : i32, i32
  }
  func.func @transform_4(%arg0: i32) -> (i32, i32, i32) {
    %c0_i32 = arith.constant 0 : i32
    %c0_i32_0 = arith.constant 0 : i32
    %c0_i32_1 = arith.constant 0 : i32
    %c0_i32_2 = arith.constant 0 : i32
    return %c0_i32, %c0_i32_0, %c0_i32_1 : i32, i32, i32
  }
}

</mosaic_0001>

<bundles_post_ra>
// kernel: resnet_forward.2
= control target key start
LH: loop header
LB: loop body
LE: loop exit
PB: predicated region body
PF: predicated region fallthrough
CT: control target
= control target key end

     0   :  { %vm30_vm0 = vcmask 1043456   ;;  %vm119_vm1 = vcmask 1040384   ;;  %vm120_vm2 = vsmask.f32 256  ;;  %v202_v0 = vmov 0.0   ;;  %s315_s1 = inlined_call_operand.vmem [shape: bf16[8,128], index: 1, kind: input, shape index: {}]   ;;  %s316_s4 = inlined_call_operand.vmem [shape: bf16[2,10,128], index: 4, kind: output, shape index: {}]   ;;  %s317_s0 = inlined_call_operand.vmem [shape: bf16[2,8,8], index: 0, kind: input, shape index: {}]   ;;  %s318_s2 = inlined_call_operand.vmem [shape: f32[1,128], index: 2, kind: input, shape index: {}]   ;;  %s319_s3 = inlined_call_operand.vmem [shape: f32[1,128], index: 3, kind: input, shape index: {}]  }
   0x1   :  { %191 = vmatprep.subr.bf16.mxu0 %v202_v0  ;;  %v20_v1 = vld [vmem:[%s315_s1] sm:$0xf]  ;;  %vm233_vm3 = vmand %vm119_vm1, %vm120_vm2  ;;  %v125_v6 = vld [vmem:[%s316_s4 + $0x8] sm:$0x1]  ;;  %vm203_vm4 = vmmov 0   ;;  %vm26_vm5 = vcmask 64512   ;;  %v102_v35 = vlaneseq }
   0x2   :  { %v122_v3 = vld [vmem:[%s316_s4] sm:$0x1]  ;;  %v32_v4 = vsel %vm30_vm0, %v20_v1, 0  ;;  %v126_v8 = vsel %vm233_vm3, 0, %v125_v6  ;;  %193 = vmatprep.mubr.msk.bf16.mxu0 %vm203_vm4, %v202_v0  ;;  %vm157_vm6 = vsmask.f32 7938 }
   0x3   :  { %v123_v5 = vsel %vm233_vm3, 0, %v122_v3  ;;  %v199_v7 = vld [vmem:[%s317_s0] sm:$0xff]   ;;  %192 = vmatpush3.bf16.msra.mxu0 %v32_v4  ;;  %127 = vst [vmem:[%s316_s4 + $0x8] sm:$0x1] %v126_v8  ;;  %v103_v36 = vshrl.u32 %v102_v35, 7  ;;  %vm265_vm7 = vmand %vm30_vm0, %vm157_vm6 }
   0x4   :  { %124 = vst [vmem:[%s316_s4] sm:$0x1] %v123_v5  ;;  %v98_v37 = vld [vmem:[%s318_s2] sm:$0x1]  ;;  %v162_v61 = vld [vmem:[%s316_s4 + $0x4] sm:$0x1]  ;;  %vm171_vm8 = vmand %vm119_vm1, %vm157_vm6 }
   0x5   :  { %v104_v38 = vsub.s32 0, %v103_v36  ;;  %v184_v44 = vld [vmem:[%s319_s3] ss:$0 sm:$0xff]  ;;  %v168_v63 = vld [vmem:[%s316_s4 + $0xc] sm:$0x1] }
   0x6   :  { %194 = vmatmul.mubr.msk.bf16.vlgmr.msra.gmra.mxu0 %vm26_vm5, %v199_v7 }
   0xa   :  { %v165_v62 = vld [vmem:[%s316_s4 + $0x8] sm:$0xf] }
   0xb   :  { %v159_v60 = vld [vmem:[%s316_s4] sm:$0xf] }
  0xc6   :  { %v68_v9 = vpop.f32.mrf.mxu0 }
  0xc7   :  { %v83_v12 = vmul.f32 %v68_v9, %v68_v9 }
  0xc8   :  { %v195_v10 = vpop.f32.mrf.mxu0 }
  0xca   :  { %v71_v11 = vpop.f32.mrf.mxu0 }
  0xcb   :  { %v75_v13 = vadd.f32 %v71_v11, %v68_v9  ;;  %v84_v14 = vmul.f32 %v71_v11, %v71_v11 }
  0xcc   :  { %v196_v15 = vpop.f32.mrf.mxu0 }
  0xcd   :  { %v76_v16 = vrot.slane %v75_v13, 4  ;;  %v85_v17 = vadd.f32 %v84_v14, %v83_v12 }
  0xcf   :  { %v77_v18 = vadd.f32 %v76_v16, %v75_v13  ;;  %v86_v19 = vrot.slane %v85_v17, 4 }
  0xd1   :  { %v78_v20 = vrot.slane %v77_v18, 2  ;;  %v87_v21 = vadd.f32 %v86_v19, %v85_v17 }
  0xd3   :  { %v79_v22 = vadd.f32 %v78_v20, %v77_v18  ;;  %v88_v23 = vrot.slane %v87_v21, 2 }
  0xd5   :  { %v80_v24 = vrot.slane %v79_v22, 1  ;;  %v89_v25 = vadd.f32 %v88_v23, %v87_v21 }
  0xd7   :  { %v81_v26 = vadd.f32 %v80_v24, %v79_v22  ;;  %v90_v27 = vrot.slane %v89_v25, 1 }
  0xd9   :  { %v82_v28 = vmul.f32 0.0625, %v81_v26  ;;  %v91_v29 = vadd.f32 %v90_v27, %v89_v25 }
  0xdb   :  { %v92_v30 = vmul.f32 0.0625, %v91_v29  ;;  %v93_v31 = vmul.f32 %v82_v28, %v82_v28  ;;  %v100_v41 = vsub.f32 %v68_v9, %v82_v28  ;;  %v101_v42 = vsub.f32 %v71_v11, %v82_v28 }
  0xdd   :  { %v94_v32 = vsub.f32 %v92_v30, %v93_v31 }
  0xdf   :  { %v95_v33 = vmax.f32 %v94_v32, 0.0 }
  0xe1   :  { %v96_v34 = vadd.f32 1e-05, %v95_v33 }
  0xe3   :  { %200 = vrsqrt.f32 %v96_v34 }
  0xf0   :  { %v201_v39 = vpop.eup %200 }
  0xf1   :  { %v99_v40 = vmul.f32 %v201_v39, %v98_v37 }
  0xf3   :  { %v105_v43 = vrot.slane %v99_v40, %v104_v38 }
  0xf5   :  { %v106_v45 = vmul.f32 %v105_v43, %v100_v41  ;;  %v107_v46 = vmul.f32 %v105_v43, %v101_v42 }
  0xf7   :  { %v115_v47 = vadd.f32 %v184_v44, %v106_v45  ;;  %v116_v48 = vadd.f32 %v184_v44, %v107_v46 }
  0xf9   :  { %v117_v49 = vmax.f32 %v115_v47, 0.0  ;;  %v118_v50 = vmax.f32 %v116_v48, 0.0 }
  0xfb   :  { %v187_v51 = vpack.c.bf16 %v117_v49, %v117_v49  ;;  %v188_v52 = vpack.c.bf16 %v118_v50, %v118_v50 }
  0xfd   :  { %v137_v53 = vshrl.u32 %v187_v51, 16  ;;  %v145_v54 = vshrl.u32 %v188_v52, 16  ;;  %v140_v57 = vshll.u32 %v187_v51, 16  ;;  %v148_v59 = vshll.u32 %v188_v52, 16 }
  0xff   :  { %v139_v56 = vrot.slane %v137_v53, 7  ;;  %v147_v58 = vrot.slane %v145_v54, 7 }
 0x101   :  { %v142_v0 = vor.u32 %v140_v57, %v139_v56  ;;  %v143_v1 = vrot.slane %v139_v56, 4  ;;  %v150_v3 = vor.u32 %v148_v59, %v147_v58  ;;  %v151_v4 = vrot.slane %v147_v58, 4 }
 0x103   :  { %v160_v5 = vsel %vm265_vm7, %v142_v0, %v159_v60  ;;  %v163_v6 = vsel %vm233_vm3, %v143_v1, %v162_v61  ;;  %v166_v7 = vsel %vm265_vm7, %v150_v3, %v165_v62  ;;  %v169_v8 = vsel %vm233_vm3, %v151_v4, %v168_v63 }
 0x104   :  { %161 = vst [vmem:[%s316_s4] sm:$0xf] %v160_v5  ;;  %164 = vst [vmem:[%s316_s4 + $0x4] sm:$0x1] %v163_v6 }
 0x105   :  { %167 = vst [vmem:[%s316_s4 + $0x8] sm:$0xf] %v166_v7  ;;  %170 = vst [vmem:[%s316_s4 + $0xc] sm:$0x1] %v169_v8 }
 0x10b   :  { %v172_v2 = vld [vmem:[%s316_s4 + $0x4] sm:$0x1] }
 0x10c   :  { %v175_v9 = vld [vmem:[%s316_s4 + $0xc] sm:$0x1]  ;;  %v173_v10 = vsel %vm171_vm8, 0, %v172_v2 }
 0x10d   :  { %v176_v11 = vsel %vm171_vm8, 0, %v175_v9  ;;  %174 = vst [vmem:[%s316_s4 + $0x4] sm:$0x1] %v173_v10 }
 0x10e   :  { %177 = vst [vmem:[%s316_s4 + $0xc] sm:$0x1] %v176_v11 }

// kernel: resnet_forward.3
= control target key start
LH: loop header
LB: loop body
LE: loop exit
PB: predicated region body
PF: predicated region fallthrough
CT: control target
= control target key end

     0   :  { %12 = vsyncpa [#allocation5], 0  ;;  %s2658_s0 = inlined_call_operand.vmem [shape: bf16[20,128], index: 0, kind: input, shape index: {}]   ;;  %s2659_s1 = inlined_call_operand.hbm [shape: bf16[2,3,128,128], index: 1, kind: input, shape index: {}]   ;;  %s2660_s2 = inlined_call_operand.vmem [shape: f32[2,1,128], index: 2, kind: input, shape index: {}]   ;;  %s2661_s3 = inlined_call_operand.vmem [shape: f32[2,1,128], index: 3, kind: input, shape index: {}]   ;;  %s2662_s4 = inlined_call_operand.hbm [shape: bf16[2,3,128,128], index: 4, kind: input, shape index: {}]   ;;  %s2663_s5 = inlined_call_operand.vmem [shape: f32[2,1,128], index: 5, kind: input, shape index: {}]   ;;  %s2664_s6 = inlined_call_operand.vmem [shape: f32[2,1,128], index: 6, kind: input, shape index: {}]   ;;  %s2665_s7 = inlined_call_operand.vmem [shape: f32[2,128], index: 7, kind: output, shape index: {}]  }
   0x1   :  { %14 = vsyncpa [#allocation5 + $0x1], 0 }
   0x2   :  { %15 = vsyncpa [#allocation7], 0 }
   0x3   :  { %17 = vsyncpa [#allocation7 + $0x1], 0  ;;  %s2295_s24 = smov 0   ;;  %s2297_s25 = smov 0  }
   0x4   :  { %s2299_s26 = smov 0   ;;  %s2301_s27 = smov 0  }
   0x5 LB: > { %s2314_s28 = sadd.s32 4294967295, %s2247_s27   ;;  %s2317_s29 = sadd.s32 1, %s2247_s27   ;;  %s2247_s27 = sphi %s2301_s27, %s2681_s27   ;;  %s2243_s26 = sphi %s2299_s26, %s2680_s26   ;;  %s2239_s25 = sphi %s2297_s25, %s2679_s25   ;;  %s2235_s24 = sphi %s2295_s24, %s2678_s24  }
   0x6   : > { %s48_s30 = ssub.s32 %s2247_s27, %s2317_s29  ;;  %s51_s8 = sadd.s32 1, %s2243_s26 }
   0x7   : > { %p49_p0 = scmp.eq.s32.totalorder %s48_s30, 0  ;;  %p58_p1 = scmp.ne.s32.totalorder %s2243_s26, %s2239_s25 }
   0x8   : > { %p59_p2 = scmp.eq.s32.totalorder %s2247_s27, 0  ;;  %p64_p3 = scmp.ne.s32.totalorder %s2239_s25, %s2235_s24 }
   0x9   : > { %s2327_s9 = scalar_select %p49_p0, %s2243_s26, %s51_s8  }
   0xa   : > { %p60_p4 = por %p59_p2, %p58_p1  ;;  %p65_p5 = scmp.eq.s32.totalorder %s2314_s28, 0 }
   0xb   : > { %p2056_p6 = scmp.lt.s32.totalorder %s2247_s27, 2  ;;  %s2336_s11 = sand.u32 1, %s2243_s26  }
   0xc   : > { %p2331_p7 = por %p65_p5, %p64_p3  ;;  %s2034_s12 = smul.u32 192, %s2336_s11 }
   0xd   : > { %s2035_s13 = smul.u32 3072, %s2247_s27  ;;  %p2340_p8 = pnand %p2056_p6, %p60_p4 }
   0xe   : > { %s2667_s10 = scalar_select %p2331_p7, 1, 0 }
   0xf   : > { %s2349_s17 = scalar_lea.hbm %s2659_s1, %s2035_s13  ;;  %s246_s18 = scalar_lea.vmem [#allocation4], %s2034_s12 }
  0x10   : > { %s253_s19 = sshll.u32 %s246_s18, 4  ;;  %s243_s20 = scalar_lea.sflag [#allocation5], %s2336_s11  ;;  %s2353_s19 = int_to_ptr.vmem [resolvable:$true] %s253_s19 }
  0x11   : > { %s2153_s21 = scalar_lea.hbm %s2349_s17, 3072  ;;  %p2155_p11 = pneg %p2340_p8 }
  0x12   : > { %p2154_p10 = scmp.ne.s32.totalorder %s2349_s17, %s2153_s21  ;;  %s2158_s24 = scalar_lea.hbm %s2659_s1, 6144 }
  0x13   : > { %p2159_p0 = scmp.lt.s32.totalorder %s2349_s17, %s2659_s1  ;;  %p2160_p1 = scmp.lt.s32.totalorder %s2158_s24, %s2153_s21 }
  0x14   : > { %p2156_p12 = pnand %p2155_p11, %p2154_p10 }
  0x15   : > { %p2161_p2 = por %p2160_p1, %p2159_p0 }
  0x16   : > { %p2157_p13 = pneg %p2156_p12 }
  0x18   : > { %p2162_p3 = pnand %p2161_p2, %p2157_p13 }
  0x1a   : > { %2165 = shalt.err (!%p2162_p3)
}
  0x1b   : > { %s2166_s15 = scalar_lea.vmem %s2353_s19, 3072  ;;  %s2249_s16 = smov [#allocation4]  }
  0x1c   : > { %p2167_p4 = scmp.ne.s32.totalorder %s2353_s19, %s2166_s15  ;;  %s2171_s18 = sshll.u32 %s2249_s16, 4  ;;  %s2172_s18 = int_to_ptr.vmem [resolvable:$false] %s2171_s18 }
  0x1d   : > { %s2173_s22 = scalar_lea.vmem %s2172_s18, 6144  ;;  %p2174_p10 = scmp.lt.s32.totalorder %s2353_s19, %s2172_s18 }
  0x1e   : > { %p2169_p5 = pnand %p2167_p4, %p2155_p11  ;;  %p2175_p12 = scmp.lt.s32.totalorder %s2173_s22, %s2166_s15 }
  0x20   : > { %p2170_p6 = pneg %p2169_p5  ;;  %p2176_p9 = por %p2175_p12, %p2174_p10 }
  0x22   : > { %p2177_p0 = pnand %p2176_p9, %p2170_p6 }
  0x24   : > { %2180 = shalt.err (!%p2177_p0)
}
  0x25   : > { %s2250_s21 = smov 64   ;;  %s2251_s23 = smov 4  }
  0x26   : > { %2052 = dma.hbm_to_vmem [thread:$0]  (!%p2340_p8), %s2349_s17, 3072, %s2353_s19, %s243_s20, %s2250_s21, %s2250_s21, %s2251_s23  }
  0x27   : > { %p306_p9 = scmp.lt.s32.totalorder %s2247_s27, 3  ;;  %s2392_s8 = scalar_lea.hbm %s2662_s4, %s2035_s13 }
  0x28   : > { %p2669_p13 = scmp.ge.s32.totalorder %s2247_s27, 1  ;;  %s279_s16 = scalar_lea.vmem [#allocation6], %s2034_s12 }
  0x29   : > { %s286_s18 = sshll.u32 %s279_s16, 4  ;;  %s276_s17 = scalar_lea.sflag [#allocation7], %s2336_s11  ;;  %s2402_s18 = int_to_ptr.vmem [resolvable:$true] %s286_s18 }
  0x2a   : > { %p2396_p1 = pnand %p2669_p13, %p306_p9  ;;  %s2181_s19 = scalar_lea.hbm %s2392_s8, 3072 }
  0x2b   : > { %p2182_p2 = scmp.ne.s32.totalorder %s2392_s8, %s2181_s19  ;;  %s2186_s20 = scalar_lea.hbm %s2662_s4, 6144 }
  0x2c   : > { %p2187_p5 = scmp.lt.s32.totalorder %s2392_s8, %s2662_s4  ;;  %p2188_p6 = scmp.lt.s32.totalorder %s2186_s20, %s2181_s19 }
  0x2d   : > { %p2184_p3 = pnand %p2182_p2, %p2155_p11 }
  0x2e   : > { %p2189_p10 = por %p2188_p6, %p2187_p5 }
  0x2f   : > { %p2185_p4 = pneg %p2184_p3 }
  0x31   : > { %p2190_p12 = pnand %p2189_p10, %p2185_p4 }
  0x33   : > { %2193 = shalt.err (!%p2190_p12)
}
  0x34   : > { %s2194_s11 = scalar_lea.vmem %s2402_s18, 3072  ;;  %s2252_s12 = smov [#allocation6]  }
  0x35   : > { %p2195_p0 = scmp.ne.s32.totalorder %s2402_s18, %s2194_s11  ;;  %s2199_s30 = sshll.u32 %s2252_s12, 4  ;;  %s2200_s30 = int_to_ptr.vmem [resolvable:$false] %s2199_s30 }
  0x36   : > { %s2201_s16 = scalar_lea.vmem %s2200_s30, 6144  ;;  %p2202_p2 = scmp.lt.s32.totalorder %s2402_s18, %s2200_s30 }
  0x37   : > { %p2197_p9 = pnand %p2195_p0, %p2155_p11  ;;  %p2203_p3 = scmp.lt.s32.totalorder %s2201_s16, %s2194_s11 }
  0x39   : > { %p2198_p13 = pneg %p2197_p9  ;;  %p2204_p7 = por %p2203_p3, %p2202_p2 }
  0x3b   : > { %p2205_p5 = pnand %p2204_p7, %p2198_p13 }
  0x3d   : > { %2208 = shalt.err (!%p2205_p5)
}
  0x3e   : > { %2055 = dma.hbm_to_vmem [thread:$0]  (!%p2340_p8), %s2392_s8, 3072, %s2402_s18, %s276_s17, %s2250_s21, %s2250_s21, %s2251_s23  }
  0x3f   : > { %310 = sbr.rel (%p2396_p1) target bundleno = 764 (0x2fc), region = 48  ;;  %s312_s19 = sand.u32 (!%p2396_p1), 1, %s2239_s25  }
  0x40   : > { %s2038_s27 = smul.u32 (!%p2396_p1), 192, %s312_s19  ;;  %s313_s13 = scalar_lea.sflag (!%p2396_p1), [#allocation5], %s312_s19 }
  0x41   : > { %p2671_p7 = scmp.ne.s32.totalorder (!%p2396_p1), %s2667_s10, 0 }
  0x42   : > { %s2433_s20 = scalar_lea.vmem (!%p2396_p1), [#allocation4], %s2038_s27 }
  0x44   : > { %2226 = dma.done.wait (%p2671_p7), %s313_s13, 3072  }
  0x45   : > { %2228 = vsyncadd (%p2671_p7), %s313_s13, 4294964224  ;;  %s322_s14 = scalar_lea.sflag [#allocation7], %s312_s19  ;;  %s2439_s22 = scalar_lea.vmem [#allocation6], %s2038_s27 }
  0x46   : > { %2230 = dma.done.wait (%p2671_p7), %s322_s14, 3072  }
  0x47   : > { %2232 = vsyncadd (%p2671_p7), %s322_s14, 4294964224  ;;  %p368_p8 = scmp.lt.s32.totalorder %s2314_s28, 1  ;;  %p1713_p11 = scmp.ne.s32.totalorder %s2314_s28, 0 }
  0x49   : > { %s2447_s21 = scalar_select %p368_p8, %s2314_s28, 1 }
  0x4a   : > { %384 = sbr.rel (%p1713_p11) target bundleno = 81 (0x51), region = 60 }
  0x4b   : > { %s370_s15 = scalar_lea.vmem %s2660_s2, %s2447_s21  ;;  %s373_s24 = scalar_lea.vmem %s2661_s3, %s2447_s21 }
  0x4c   : > { %s376_s12 = scalar_lea.vmem %s2663_s5, %s2447_s21  ;;  %s379_s19 = scalar_lea.vmem %s2664_s6, %s2447_s21 }
  0x4f   : > { %v385_v0 = vld [vmem:[%s2658_s0] sm:$0xff]   ;;  %v387_v1 = vld [vmem:[%s2658_s0 + $0x8] sm:$0x3] }
  0x50   : > { %388 = vst [vmem:[#allocation2] sm:$0xff] %v385_v0   ;;  %390 = vst [vmem:[#allocation2 + $0x8] sm:$0x3] %v387_v1 }
  0x51 PF: > { %v2093_v2 = vld [vmem:[%s2433_s20 + $0x78] sm:$0xff]   ;;  %v2095_v4 = vld [vmem:[%s2433_s20 + $0x70] sm:$0xff]   ;;  %v2097_v6 = vld [vmem:[%s2433_s20 + $0x68] sm:$0xff]   ;;  %vm497_vm0 = vsmask.f32 7424  ;;  %vm733_vm1 = vcmask 1046528   ;;  %v391_v62 = vlaneseq }
  0x52   : > { %v2094_v3 = vld [vmem:[%s2433_s20 + $0x38] sm:$0xff]   ;;  %1914 = vmatprep.subr.bf16.mxu0 %v2093_v2  ;;  %v2096_v5 = vld [vmem:[%s2433_s20 + $0x30] sm:$0xff]   ;;  %v2098_v7 = vld [vmem:[%s2433_s20 + $0x28] sm:$0xff]   ;;  %vm895_vm2 = vcmask 1040384   ;;  %vm896_vm3 = vsmask.f32 256 }
  0x53   : > { %1934 = vmatprep.subr.bf16.mxu1 %v2094_v3  ;;  %1915 = vmatpush3.bf16.msra.mxu0 %v2093_v2  ;;  %v2099_v8 = vld [vmem:[%s2433_s20 + $0x60] sm:$0xff]   ;;  %v2101_v10 = vld [vmem:[%s2433_s20 + $0x58] sm:$0xff]   ;;  %v2103_v12 = vld [vmem:[%s2433_s20 + $0x50] sm:$0xff]   ;;  %v2521_v0 = vshrl.u32 %v391_v62, 7  ;;  %p1845_p1 = scmp.ne.s32.totalorder %s2314_s28, 1 }
  0x54   : > { %1935 = vmatpush3.bf16.msra.mxu1 %v2094_v3  ;;  %1916 = vmatprep.subr.bf16.mxu0 %v2095_v4  ;;  %v2100_v9 = vld [vmem:[%s2433_s20 + $0x20] sm:$0xff]   ;;  %v2102_v11 = vld [vmem:[%s2433_s20 + $0x18] sm:$0xff]   ;;  %v2104_v15 = vld [vmem:[%s2433_s20 + $0x10] sm:$0xff]  }
  0x55   : > { %1936 = vmatprep.subr.bf16.mxu1 %v2096_v5  ;;  %v2105_v18 = vld [vmem:[%s2433_s20 + $0x48] sm:$0xff]   ;;  %v2107_v26 = vld [vmem:[%s2433_s20 + $0x40] sm:$0xff]   ;;  %v2112_v31 = vld [vmem:[%s2433_s20 + $0xb8] sm:$0xff]   ;;  %v394_v1 = vadd.s32 16, %v2521_v0 }
  0x56   : > { %v2106_v19 = vld [vmem:[%s2433_s20 + $0x8] sm:$0xff]   ;;  %v2108_v27 = vld [vmem:[%s2433_s20] sm:$0xff]   ;;  %v2113_v37 = vld [vmem:[%s2433_s20 + $0xb0] sm:$0xff]  }
  0x57   : > { %1917 = vmatpush3.bf16.msra.mxu0 %v2095_v4  ;;  %v452_v13 = vld [vmem:[#allocation2] sm:$0xf]  ;;  %v453_v14 = vld [vmem:[#allocation2 + $0x4] sm:$0xf]  ;;  %v2115_v40 = vld [vmem:[%s2433_s20 + $0xa0] sm:$0xff]  }
  0x58   : > { %1937 = vmatpush3.bf16.msra.mxu1 %v2096_v5  ;;  %1918 = vmatprep.subr.bf16.mxu0 %v2097_v6  ;;  %v1733_v16 = vcombine.low %v452_v13, %v453_v14  ;;  %v2484_v17 = vld [vmem:[#allocation2 + $0x8] ss:$0 sps:$4 sm:$0x33]   ;;  %v712_v30 = vld [vmem:[#allocation2] sm:$0xe]  ;;  %v2116_v41 = vld [vmem:[%s2433_s20 + $0x98] sm:$0xff]  }
  0x59   : > { %1938 = vmatprep.subr.bf16.mxu1 %v2098_v7  ;;  %v506_v22 = vshll.u32 %v2484_v17, 16  ;;  %v510_v29 = vshrl.u32 %v2484_v17, 16  ;;  %v1768_v32 = vcombine.low %v712_v30, %v453_v14  ;;  %v735_v33 = vrot.slane %v2484_v17, 1  ;;  %v2111_v34 = vld [vmem:[#allocation2 + $0x8] ss:$0 sps:$4 sm:$0x11]   ;;  %vm897_vm4 = vmand %vm895_vm2, %vm896_vm3 }
  0x5a   : > { %v499_v20 = vshrl.u32 %v1733_v16, 16  ;;  %v501_v21 = vshll.u32 %v1733_v16, 16  ;;  %1950 = vmatprep.mubr.bf16.mxu1 %v1733_v16  ;;  %v2114_v39 = vld [vmem:[%s2433_s20 + $0xa8] sm:$0xff]   ;;  %v2117_v42 = vld [vmem:[%s2433_s20 + $0x90] sm:$0xff]   ;;  %v2119_v44 = vld [vmem:[%s2433_s20 + $0x80] sm:$0xff]  }
  0x5b   : > { %1919 = vmatpush3.bf16.msra.mxu0 %v2097_v6  ;;  %v508_v24 = vrot.slane %v506_v22, 1  ;;  %v734_v36 = vrot.slane %v1768_v32, 1  ;;  %v2118_v43 = vld [vmem:[%s2433_s20 + $0x88] sm:$0xff]   ;;  %v2121_v45 = vld [vmem:[%s2439_s22 + $0x38] sm:$0xff]   ;;  %v2122_v46 = vld [vmem:[%s2439_s22 + $0x30] sm:$0xff]   ;;  %v393_v6 = vadd.s32 8, %v2521_v0 }
  0x5c   : > { %1939 = vmatpush3.bf16.msra.mxu1 %v2098_v7  ;;  %1920 = vmatprep.subr.bf16.mxu0 %v2099_v8  ;;  %v503_v23 = vrot.slane %v501_v21, 1  ;;  %v2123_v47 = vld [vmem:[%s2439_s22 + $0x28] sm:$0xff]   ;;  %v898_v48 = vld [vmem:[#allocation3] sm:$0x1]  ;;  %v2124_v50 = vld [vmem:[%s2439_s22 + $0x20] sm:$0xff]  }
  0x5d   : > { %1940 = vmatprep.subr.bf16.mxu1 %v2100_v9  ;;  %v512_v35 = vor.u32 %v510_v29, %v508_v24  ;;  %v736_v38 = vsel %vm733_vm1, %v734_v36, %v735_v33  ;;  %v899_v49 = vsel %vm897_vm4, 0, %v898_v48  ;;  %v2125_v51 = vld [vmem:[%s2439_s22 + $0x78] sm:$0xff]   ;;  %v2127_v53 = vld [vmem:[%s2439_s22 + $0x70] sm:$0xff]   ;;  %v2129_v55 = vld [vmem:[%s2439_s22 + $0x68] sm:$0xff]  }
  0x5e   : > { %v504_v25 = vor.u32 %v503_v23, %v499_v20  ;;  %900 = vst [vmem:[#allocation3] sm:$0x1] %v899_v49  ;;  %v2126_v52 = vld [vmem:[%s2439_s22 + $0x18] sm:$0xff]   ;;  %v2128_v54 = vld [vmem:[%s2439_s22 + $0x10] sm:$0xff]   ;;  %v2130_v56 = vld [vmem:[%s2439_s22 + $0x8] sm:$0xff]  }
  0x5f   : > { %1921 = vmatpush3.bf16.msra.mxu0 %v2099_v8  ;;  %v2131_v57 = vld [vmem:[%s2439_s22 + $0x60] sm:$0xff]   ;;  %v2133_v59 = vld [vmem:[%s2439_s22 + $0x58] sm:$0xff]   ;;  %v2137_v60 = vld [vmem:[%s2439_s22 + $0x50] sm:$0xff]  }
  0x60   : > { %1941 = vmatpush3.bf16.msra.mxu1 %v2100_v9  ;;  %1922 = vmatprep.subr.bf16.mxu0 %v2101_v10  ;;  %v509_v28 = vsel %vm497_vm0, %v504_v25, %v508_v24  ;;  %v2132_v58 = vld [vmem:[%s2439_s22] sm:$0xff]   ;;  %v2138_v61 = vld [vmem:[%s2439_s22 + $0x48] sm:$0xff]   ;;  %v2525_v3 = vld [vmem:[%s2439_s22 + $0xb8] sm:$0xff]   ;;  %v2529_v8 = vmul.u32.u64.low 3435973837, %v394_v1  ;;  %v2530_v9 = vmul.u32.u64.high 3435973837, %v394_v1, %v2529_v8 }
  0x61   : > { %1942 = vmatprep.subr.bf16.mxu1 %v2102_v11  ;;  %1930 = vmatprep.mubr.bf16.mxu0 %v509_v28  ;;  %v2139_v63 = vld [vmem:[%s2439_s22 + $0x40] sm:$0xff]  }
  0x62   : > { %v423_v16 = vshrl.u32 %v2530_v9, 3 }
  0x63   : > { %1923 = vmatpush3.bf16.msra.mxu0 %v2101_v10 }
  0x64   : > { %1943 = vmatpush3.bf16.msra.mxu1 %v2102_v11  ;;  %1924 = vmatprep.subr.bf16.mxu0 %v2103_v12 }
  0x65   : > { %1944 = vmatprep.subr.bf16.mxu1 %v2104_v15 }
  0x67   : > { %1925 = vmatpush3.bf16.msra.mxu0 %v2103_v12  ;;  %v2533_v11 = vmul.u32.u64.low 3435973837, %v2521_v0  ;;  %v2534_v12 = vmul.u32.u64.high 3435973837, %v2521_v0, %v2533_v11 }
  0x68   : > { %1945 = vmatpush3.bf16.msra.mxu1 %v2104_v15  ;;  %1926 = vmatprep.subr.bf16.mxu0 %v2105_v18  ;;  %v2536_v14 = vmul.u32.u64.low 3435973837, %v393_v6  ;;  %v2537_v15 = vmul.u32.u64.high 3435973837, %v393_v6, %v2536_v14 }
  0x69   : > { %1946 = vmatprep.subr.bf16.mxu1 %v2106_v19  ;;  %v401_v17 = vshrl.u32 %v2534_v12, 3 }
  0x6b   : > { %1927 = vmatpush3.bf16.msra.mxu0 %v2105_v18  ;;  %v412_v18 = vshrl.u32 %v2537_v15, 3  ;;  %v402_v20 = vmul.u32 10, %v401_v17  ;;  %v870_v15 = vld [vmem:[%s370_s15] sm:$0x1] }
  0x6c   : > { %1947 = vmatpush3.bf16.msra.mxu1 %v2106_v19  ;;  %1928 = vmatprep.subr.bf16.mxu0 %v2107_v26  ;;  %v424_v19 = vmul.u32 10, %v423_v16  ;;  %v877_v16 = vsub.s32 0, %v2521_v0 }
  0x6d   : > { %1948 = vmatprep.subr.bf16.mxu1 %v2108_v27  ;;  %v413_v21 = vmul.u32 10, %v412_v18  ;;  %v403_v23 = vsub.s32 %v2521_v0, %v402_v20 }
  0x6e   : > { %v425_v22 = vsub.s32 %v394_v1, %v424_v19 }
  0x6f   : > { %1929 = vmatpush3.bf16.msra.mxu0 %v2107_v26  ;;  %v414_v24 = vsub.s32 %v393_v6, %v413_v21  ;;  %vm428_vm7 = vcmp.ne.s32.totalorder %v403_v23, 0  ;;  %vm431_vm8 = vcmp.lt.s32.totalorder %v403_v23, 0  ;;  %v437_v26 = vadd.s32 10, %v403_v23 }
  0x70   : > { %1949 = vmatpush3.bf16.msra.mxu1 %v2108_v27  ;;  %1954 = vmatprep.subr.bf16.mxu0 %v2112_v31  ;;  %vm430_vm5 = vcmp.ne.s32.totalorder %v425_v22, 0  ;;  %vm433_vm6 = vcmp.lt.s32.totalorder %v425_v22, 0  ;;  %v439_v25 = vadd.s32 10, %v425_v22  ;;  %vm434_vm12 = vmand %vm431_vm8, %vm428_vm7  ;;  %vm944_vm7 = vcmask 1043456  }
  0x71   : > { %1974 = vmatprep.subr.bf16.mxu1 %v2125_v51  ;;  %vm436_vm9 = vmand %vm433_vm6, %vm430_vm5  ;;  %vm429_vm10 = vcmp.ne.s32.totalorder %v414_v24, 0  ;;  %vm432_vm11 = vcmp.lt.s32.totalorder %v414_v24, 0  ;;  %v438_v27 = vadd.s32 10, %v414_v24  ;;  %v440_v30 = vsel %vm434_vm12, %v437_v26, %v403_v23  ;;  %v1777_v23 = vld [vmem:[%s373_s24] ss:$0 sm:$0xff] }
  0x72   : > { %1931 = vmatmul.mubr.bf16.vlgmr.msra.gmra.mxu0 %v512_v35  ;;  %v442_v28 = vsel %vm436_vm9, %v439_v25, %v425_v22  ;;  %vm435_vm13 = vmand %vm432_vm11, %vm429_vm10  ;;  %vm443_vm15 = vcmp.lt.s32.totalorder %v440_v30, 8  ;;  %vm842_vm5 = vcmask 1041408   ;;  %vm914_vm6 = vsmask.f32 4368 }
  0x73   : > { %1951 = vmatmul.mubr.bf16.vlgmr.msra.gmra.mxu1 %v2111_v34  ;;  %1955 = vmatpush3.bf16.msra.mxu0 %v2112_v31  ;;  %vm445_vm14 = vcmp.lt.s32.totalorder %v442_v28, 8  ;;  %vm945_vm8 = vsmask.f32 7938  ;;  %vm952_vm9 = vsmask.f32 1280  ;;  %vm2571_vm10 = vmor %vm896_vm3, %vm914_vm6  ;;  %vm957_vm12 = vcmask 1041409  }
  0x74   : > { %1956 = vmatprep.subr.bf16.mxu0 %v2113_v37  ;;  %1970 = vmatprep.mubr.bf16.mxu0 %v736_v38  ;;  %v2253_v38 = vmov 0.0   ;;  %vm2575_vm11 = vmand %vm944_vm7, %vm945_vm8 }
  0x75   : > { %1975 = vmatpush3.bf16.msra.mxu1 %v2125_v51  ;;  %vm2581_vm3 = vmand %vm842_vm5, %vm952_vm9 }
  0x76   : > { %1976 = vmatprep.subr.bf16.mxu1 %v2127_v53 }
  0x77   : > { %1957 = vmatpush3.bf16.msra.mxu0 %v2113_v37 }
  0x78   : > { %1958 = vmatprep.subr.bf16.mxu0 %v2114_v39 }
  0x79   : > { %1977 = vmatpush3.bf16.msra.mxu1 %v2127_v53 }
  0x7a   : > { %1978 = vmatprep.subr.bf16.mxu1 %v2129_v55 }
  0x7b   : > { %1959 = vmatpush3.bf16.msra.mxu0 %v2114_v39  ;;  %v2543_v39 = vsel %vm445_vm14, 1.0, %v2253_v38 }
  0x7c   : > { %1960 = vmatprep.subr.bf16.mxu0 %v2115_v40 }
  0x7d   : > { %1979 = vmatpush3.bf16.msra.mxu1 %v2129_v55 }
  0x7e   : > { %1980 = vmatprep.subr.bf16.mxu1 %v2131_v57 }
  0x7f   : > { %1961 = vmatpush3.bf16.msra.mxu0 %v2115_v40 }
  0x80   : > { %1962 = vmatprep.subr.bf16.mxu0 %v2116_v41 }
  0x81   : > { %1981 = vmatpush3.bf16.msra.mxu1 %v2131_v57 }
  0x82   : > { %1982 = vmatprep.subr.bf16.mxu1 %v2133_v59 }
  0x83   : > { %1963 = vmatpush3.bf16.msra.mxu0 %v2116_v41  ;;  %v2545_v41 = vsel %vm443_vm15, 1.0, %v2253_v38 }
  0x84   : > { %1964 = vmatprep.subr.bf16.mxu0 %v2117_v42 }
  0x85   : > { %1983 = vmatpush3.bf16.msra.mxu1 %v2133_v59 }
  0x86   : > { %1984 = vmatprep.subr.bf16.mxu1 %v2137_v60 }
  0x87   : > { %1965 = vmatpush3.bf16.msra.mxu0 %v2117_v42 }
  0x88   : > { %1966 = vmatprep.subr.bf16.mxu0 %v2118_v43 }
  0x89   : > { %1985 = vmatpush3.bf16.msra.mxu1 %v2137_v60 }
  0x8a   : > { %1986 = vmatprep.subr.bf16.mxu1 %v2138_v61 }
  0x8b   : > { %1967 = vmatpush3.bf16.msra.mxu0 %v2118_v43 }
  0x8c   : > { %1968 = vmatprep.subr.bf16.mxu0 %v2119_v44 }
  0x8d   : > { %1987 = vmatpush3.bf16.msra.mxu1 %v2138_v61 }
  0x8e   : > { %1988 = vmatprep.subr.bf16.mxu1 %v2139_v63 }
  0x8f   : > { %1969 = vmatpush3.bf16.msra.mxu0 %v2119_v44 }
  0x90   : > { %1994 = vmatprep.subr.bf16.mxu0 %v2121_v45 }
  0x91   : > { %1989 = vmatpush3.bf16.msra.mxu1 %v2139_v63 }
  0x92   : > { %1971 = vmatmul.mubr.bf16.vlgmr.msra.gmra.mxu0 %v735_v33  ;;  %2014 = vmatprep.subr.bf16.mxu1 %v2525_v3  ;;  %v441_v33 = vsel %vm435_vm13, %v438_v27, %v414_v24  ;;  %vm958_vm13 = vsmask.f32 7942 }
  0x93   : > { %1995 = vmatpush3.bf16.msra.mxu0 %v2121_v45  ;;  %vm444_vm4 = vcmp.lt.s32.totalorder %v441_v33, 8  ;;  %vm959_vm14 = vmand %vm957_vm12, %vm958_vm13 }
  0x94   : > { %1996 = vmatprep.subr.bf16.mxu0 %v2122_v46  ;;  %v2548_v45 = vsel %vm444_vm4, 1.0, %v2253_v38 }
  0x97   : > { %1997 = vmatpush3.bf16.msra.mxu0 %v2122_v46 }
  0x98   : > { %1998 = vmatprep.subr.bf16.mxu0 %v2123_v47 }
  0x9b   : > { %1999 = vmatpush3.bf16.msra.mxu0 %v2123_v47 }
  0x9c   : > { %2000 = vmatprep.subr.bf16.mxu0 %v2124_v50 }
  0x9f   : > { %2001 = vmatpush3.bf16.msra.mxu0 %v2124_v50 }
  0xa0   : > { %2002 = vmatprep.subr.bf16.mxu0 %v2126_v52 }
  0xa3   : > { %2003 = vmatpush3.bf16.msra.mxu0 %v2126_v52 }
  0xa4   : > { %2004 = vmatprep.subr.bf16.mxu0 %v2128_v54 }
  0xa7   : > { %2005 = vmatpush3.bf16.msra.mxu0 %v2128_v54 }
  0xa8   : > { %2006 = vmatprep.subr.bf16.mxu0 %v2130_v56 }
  0xab   : > { %2007 = vmatpush3.bf16.msra.mxu0 %v2130_v56 }
  0xac   : > { %2008 = vmatprep.subr.bf16.mxu0 %v2132_v58 }
  0xaf   : > { %2009 = vmatpush3.bf16.msra.mxu0 %v2132_v58 }
 0x132   : > { %v1932_v2 = vpop.f32.mrf.mxu0 }
 0x133   : > { %v1952_v4 = vpop.f32.mrf.mxu1 }
 0x134   : > { %v597_v5 = vpop.f32.mrf.mxu0  ;;  %v707_v31 = vadd.f32 %v1952_v4, %v1932_v2 }
 0x135   : > { %v698_v7 = vpop.f32.mrf.mxu1 }
 0x136   : > { %v1933_v10 = vpop.f32.mrf.mxu0  ;;  %v699_v34 = vadd.f32 %v698_v7, %v597_v5 }
 0x137   : > { %v1953_v13 = vpop.f32.mrf.mxu1 }
 0x138   : > { %v600_v29 = vpop.f32.mrf.mxu0 }
 0x139   : > { %v701_v35 = vpop.f32.mrf.mxu1 }
 0x13a   : > { %v702_v43 = vadd.f32 %v701_v35, %v600_v29 }
 0x152   : > { %v1972_v32 = vpop.f32.mrf.mxu0 }
 0x153   : > { %v837_v36 = vadd.f32 %v1972_v32, %v707_v31 }
 0x154   : > { %v821_v37 = vpop.f32.mrf.mxu0 }
 0x155   : > { %v835_v40 = vadd.f32 %v821_v37, %v699_v34  ;;  %v840_v44 = vmul.f32 %v2543_v39, %v837_v36 }
 0x156   : > { %v1973_v42 = vpop.f32.mrf.mxu0 }
 0x157   : > { %v838_v47 = vmul.f32 %v2545_v41, %v835_v40  ;;  %v854_v50 = vmul.f32 %v840_v44, %v837_v36  ;;  %v843_v54 = vsel %vm842_vm5, %v840_v44, 0.0 }
 0x158   : > { %v824_v46 = vpop.f32.mrf.mxu0 }
 0x159   : > { %v836_v48 = vadd.f32 %v824_v46, %v702_v43  ;;  %v852_v51 = vmul.f32 %v838_v47, %v835_v40  ;;  %v856_v57 = vsel %vm842_vm5, %v854_v50, 0.0 }
 0x15b   : > { %v839_v49 = vmul.f32 %v2548_v45, %v836_v48 }
 0x15d   : > { %v841_v52 = vadd.f32 %v839_v49, %v838_v47  ;;  %v853_v53 = vmul.f32 %v839_v49, %v836_v48 }
 0x15f   : > { %v844_v55 = vadd.f32 %v843_v54, %v841_v52  ;;  %v855_v56 = vadd.f32 %v853_v53, %v852_v51  ;;  %v947_v53 = vld [vmem:[#allocation3] sm:$0xf] }
 0x161   : > { %v845_v58 = vrot.slane %v844_v55, 4  ;;  %v857_v59 = vadd.f32 %v856_v57, %v855_v56 }
 0x163   : > { %v846_v60 = vadd.f32 %v845_v58, %v844_v55  ;;  %v858_v61 = vrot.slane %v857_v59, 4 }
 0x165   : > { %v847_v62 = vrot.slane %v846_v60, 2  ;;  %v859_v63 = vadd.f32 %v858_v61, %v857_v59 }
 0x167   : > { %v848_v1 = vadd.f32 %v847_v62, %v846_v60  ;;  %v860_v2 = vrot.slane %v859_v63, 2  ;;  %v954_v60 = vld [vmem:[#allocation3 + $0x8] sm:$0x3] }
 0x169   : > { %v849_v4 = vrot.slane %v848_v1, 1  ;;  %v861_v5 = vadd.f32 %v860_v2, %v859_v63 }
 0x16b   : > { %v850_v6 = vadd.f32 %v849_v4, %v848_v1  ;;  %v862_v7 = vrot.slane %v861_v5, 1 }
 0x16d   : > { %v851_v8 = vmul.f32 0.0625, %v850_v6  ;;  %v863_v9 = vadd.f32 %v862_v7, %v861_v5 }
 0x16f   : > { %v864_v10 = vmul.f32 0.0625, %v863_v9  ;;  %v865_v11 = vmul.f32 %v851_v8, %v851_v8  ;;  %v872_v19 = vsub.f32 %v835_v40, %v851_v8  ;;  %v873_v20 = vsub.f32 %v836_v48, %v851_v8 }
 0x170   : > { %v874_v21 = vsub.f32 %v837_v36, %v851_v8 }
 0x171   : > { %v866_v12 = vsub.f32 %v864_v10, %v865_v11 }
 0x173   : > { %v867_v13 = vmax.f32 %v866_v12, 0.0 }
 0x175   : > { %v868_v14 = vadd.f32 1e-05, %v867_v13 }
 0x177   : > { %2149 = vrsqrt.f32 %v868_v14 }
 0x184   : > { %v2150_v17 = vpop.eup %2149 }
 0x185   : > { %v871_v18 = vmul.f32 %v2150_v17, %v870_v15 }
 0x187   : > { %v878_v22 = vrot.slane %v871_v18, %v877_v16 }
 0x189   : > { %v879_v24 = vmul.f32 %v878_v22, %v872_v19  ;;  %v880_v25 = vmul.f32 %v878_v22, %v873_v20  ;;  %v881_v26 = vmul.f32 %v878_v22, %v874_v21 }
 0x18b   : > { %v889_v27 = vadd.f32 %v1777_v23, %v879_v24  ;;  %v890_v28 = vadd.f32 %v1777_v23, %v880_v25  ;;  %v891_v29 = vadd.f32 %v1777_v23, %v881_v26  ;;  %v2142_v24 = vld [vmem:[%s2439_s22 + $0xb0] sm:$0xff]   ;;  %v2143_v26 = vld [vmem:[%s2439_s22 + $0xa8] sm:$0xff]  }
 0x18d   : > { %v892_v30 = vmax.f32 %v889_v27, 0.0  ;;  %v893_v31 = vmax.f32 %v890_v28, 0.0  ;;  %v894_v32 = vmax.f32 %v891_v29, 0.0  ;;  %v2144_v27 = vld [vmem:[%s2439_s22 + $0xa0] sm:$0xff]   ;;  %v2145_v28 = vld [vmem:[%s2439_s22 + $0x98] sm:$0xff]   ;;  %v2146_v29 = vld [vmem:[%s2439_s22 + $0x90] sm:$0xff]  }
 0x18f   : > { %v901_v33 = vmul.f32 %v2545_v41, %v892_v30  ;;  %v902_v34 = vmul.f32 %v2548_v45, %v893_v31  ;;  %v903_v35 = vmul.f32 %v2543_v39, %v894_v32  ;;  %v2147_v30 = vld [vmem:[%s2439_s22 + $0x88] sm:$0xff]   ;;  %v2148_v31 = vld [vmem:[%s2439_s22 + $0x80] sm:$0xff]  }
 0x191   : > { %v1848_v36 = vpack.c.bf16 %v901_v33, %v901_v33  ;;  %v1849_v37 = vpack.c.bf16 %v902_v34, %v902_v34  ;;  %v1850_v38 = vpack.c.bf16 %v903_v35, %v903_v35 }
 0x193   : > { %v917_v40 = vshrl.u32 %v1848_v36, 16  ;;  %v925_v42 = vshrl.u32 %v1849_v37, 16  ;;  %v934_v43 = vshrl.u32 %v1850_v38, 16  ;;  %v920_v47 = vshll.u32 %v1848_v36, 16 }
 0x194   : > { %v928_v49 = vshll.u32 %v1849_v37, 16  ;;  %v937_v51 = vshll.u32 %v1850_v38, 16 }
 0x195   : > { %v919_v46 = vrot.slane %v917_v40, 7  ;;  %v927_v48 = vrot.slane %v925_v42, 7  ;;  %v936_v50 = vrot.slane %v934_v43, 7 }
 0x197   : > { %v922_v54 = vor.u32 %v920_v47, %v919_v46  ;;  %v923_v55 = vrot.slane %v919_v46, 4  ;;  %v930_v56 = vor.u32 %v928_v49, %v927_v48  ;;  %v932_v57 = vrot.slane %v927_v48, 4 }
 0x198   : > { %v939_v59 = vor.u32 %v937_v51, %v936_v50 }
 0x199   : > { %v931_v61 = vsel %vm2571_vm10, %v923_v55, %v930_v56  ;;  %v948_v62 = vsel %vm2575_vm11, %v922_v54, %v947_v53 }
 0x19a   : > { %v940_v63 = vsel %vm2571_vm10, %v932_v57, %v939_v59  ;;  %949 = vst [vmem:[#allocation3] sm:$0xf] %v948_v62  ;;  %950 = vst [vmem:[#allocation3 + $0x4] sm:$0xf] %v931_v61 }
 0x19b   : > { %v955_v1 = vsel %vm2581_vm3, %v940_v63, %v954_v60 }
 0x19c   : > { %956 = vst [vmem:[#allocation3 + $0x8] sm:$0x3] %v955_v1 }
 0x1a1   : > { %v963_v2 = vld [vmem:[#allocation3] sm:$0xf]  ;;  %v964_v4 = vld [vmem:[#allocation3 + $0x4] sm:$0xf] }
 0x1a2   : > { %v1797_v5 = vcombine.low %v963_v2, %v964_v4  ;;  %v1222_v10 = vld [vmem:[#allocation3] sm:$0xe] }
 0x1a3   : > { %v960_v6 = vld [vmem:[#allocation3 + $0x8] sm:$0x2]  ;;  %v2136_v8 = vld [vmem:[#allocation3 + $0x8] ss:$0 sps:$4 sm:$0x11]   ;;  %v1832_v13 = vcombine.low %v1222_v10, %v964_v4 }
 0x1a4   : > { %v961_v7 = vsel %vm959_vm14, 0, %v960_v6  ;;  %2010 = vmatprep.mubr.bf16.mxu0 %v1797_v5  ;;  %v1011_v9 = vshll.u32 %v1797_v5, 16  ;;  %v2140_v11 = vld [vmem:[#allocation3 + $0x8] ss:$0 sps:$4 sm:$0x33]   ;;  %v1009_v14 = vshrl.u32 %v1797_v5, 16 }
 0x1a5   : > { %962 = vst [vmem:[#allocation3 + $0x8] sm:$0x2] %v961_v7  ;;  %2011 = vmatmul.mubr.bf16.vlgmr.msra.gmra.mxu0 %v2136_v8  ;;  %v1016_v15 = vshll.u32 %v2140_v11, 16  ;;  %v1020_v19 = vshrl.u32 %v2140_v11, 16  ;;  %v1244_v20 = vrot.slane %v2140_v11, 1  ;;  %v1243_v23 = vrot.slane %v1832_v13, 1 }
 0x1a6   : > { %v1013_v12 = vrot.slane %v1011_v9, 1 }
 0x1a7   : > { %v1018_v18 = vrot.slane %v1016_v15, 1  ;;  %v1245_v25 = vsel %vm733_vm1, %v1243_v23, %v1244_v20 }
 0x1a8   : > { %v1014_v17 = vor.u32 %v1013_v12, %v1009_v14 }
 0x1a9   : > { %v1022_v22 = vor.u32 %v1020_v19, %v1018_v18 }
 0x1aa   : > { %v1019_v21 = vsel %vm497_vm0, %v1014_v17, %v1018_v18 }
 0x1ab   : > { %1990 = vmatprep.mubr.bf16.mxu1 %v1019_v21 }
 0x1ac   : > { %1991 = vmatmul.mubr.bf16.vlgmr.msra.gmra.mxu1 %v1022_v22 }
 0x1ad   : > { %2015 = vmatpush3.bf16.msra.mxu1 %v2525_v3  ;;  %2030 = vmatprep.mubr.bf16.mxu1 %v1245_v25  ;;  %v1401_v25 = vld [vmem:[#allocation2 + $0x4] sm:$0xf] }
 0x1ae   : > { %2016 = vmatprep.subr.bf16.mxu1 %v2142_v24 }
 0x1b1   : > { %2017 = vmatpush3.bf16.msra.mxu1 %v2142_v24  ;;  %v1400_v24 = vld [vmem:[#allocation2] sm:$0xf] }
 0x1b2   : > { %2018 = vmatprep.subr.bf16.mxu1 %v2143_v26 }
 0x1b5   : > { %2019 = vmatpush3.bf16.msra.mxu1 %v2143_v26  ;;  %v1402_v26 = vld [vmem:[#allocation2 + $0x8] sm:$0x3] }
 0x1b6   : > { %2020 = vmatprep.subr.bf16.mxu1 %v2144_v27 }
 0x1b9   : > { %2021 = vmatpush3.bf16.msra.mxu1 %v2144_v27  ;;  %v1403_v27 = vunpack.c.l.bf16 %v1400_v24 }
 0x1ba   : > { %2022 = vmatprep.subr.bf16.mxu1 %v2145_v28 }
 0x1bd   : > { %2023 = vmatpush3.bf16.msra.mxu1 %v2145_v28  ;;  %v1404_v28 = vunpack.c.l.bf16 %v1401_v25 }
 0x1be   : > { %2024 = vmatprep.subr.bf16.mxu1 %v2146_v29 }
 0x1c1   : > { %2025 = vmatpush3.bf16.msra.mxu1 %v2146_v29  ;;  %v1405_v29 = vunpack.c.l.bf16 %v1402_v26 }
 0x1c2   : > { %2026 = vmatprep.subr.bf16.mxu1 %v2147_v30 }
 0x1c5   : > { %2027 = vmatpush3.bf16.msra.mxu1 %v2147_v30  ;;  %v1378_v30 = vld [vmem:[%s376_s12] sm:$0x1] }
 0x1c6   : > { %2028 = vmatprep.subr.bf16.mxu1 %v2148_v31 }
 0x1c9   : > { %2029 = vmatpush3.bf16.msra.mxu1 %v2148_v31 }
 0x1cc   : > { %2031 = vmatmul.mubr.bf16.vlgmr.msra.gmra.mxu1 %v1244_v20 }
 0x265   : > { %v2012_v3 = vpop.f32.mrf.mxu0 }
 0x267   : > { %v1208_v32 = vpop.f32.mrf.mxu0 }
 0x269   : > { %v2013_v33 = vpop.f32.mrf.mxu0 }
 0x26a   : > { %v1411_v33 = vrot.slane %v1404_v28, 1 }
 0x26b   : > { %v1211_v48 = vpop.f32.mrf.mxu0 }
 0x26c   : > { %v1992_v34 = vpop.f32.mrf.mxu1 }
 0x26d   : > { %v1217_v38 = vadd.f32 %v2012_v3, %v1992_v34  ;;  %v1413_v34 = vrot.slane %v1405_v29, 1 }
 0x26e   : > { %v1107_v35 = vpop.f32.mrf.mxu1 }
 0x26f   : > { %v1209_v42 = vadd.f32 %v1208_v32, %v1107_v35  ;;  %v1410_v32 = vrot.slane %v1403_v27, 1 }
 0x270   : > { %v1993_v36 = vpop.f32.mrf.mxu1 }
 0x272   : > { %v1110_v37 = vpop.f32.mrf.mxu1 }
 0x273   : > { %v1212_v50 = vadd.f32 %v1211_v48, %v1110_v37 }
 0x28c   : > { %v2032_v40 = vpop.f32.mrf.mxu1 }
 0x28d   : > { %v1346_v43 = vadd.f32 %v2032_v40, %v1217_v38  ;;  %v1841_v40 = vld [vmem:[%s379_s19] ss:$0 sm:$0xff] }
 0x28e   : > { %v1330_v46 = vpop.f32.mrf.mxu1 }
 0x28f   : > { %v1344_v47 = vadd.f32 %v1330_v46, %v1209_v42  ;;  %v1349_v51 = vmul.f32 %v2543_v39, %v1346_v43 }
 0x290   : > { %v2033_v49 = vpop.f32.mrf.mxu1 }
 0x291   : > { %v1347_v54 = vmul.f32 %v2545_v41, %v1344_v47  ;;  %v1362_v57 = vmul.f32 %v1349_v51, %v1346_v43  ;;  %v1351_v62 = vsel %vm842_vm5, %v1349_v51, 0.0  ;;  %v1412_v49 = vsel %vm733_vm1, %v1410_v32, %v1411_v33 }
 0x292   : > { %v1333_v53 = vpop.f32.mrf.mxu1 }
 0x293   : > { %v1345_v55 = vadd.f32 %v1333_v53, %v1212_v50  ;;  %v1360_v59 = vmul.f32 %v1347_v54, %v1344_v47  ;;  %v1364_v2 = vsel %vm842_vm5, %v1362_v57, 0.0  ;;  %v1414_v50 = vsel %vm733_vm1, %v1411_v33, %v1413_v34 }
 0x295   : > { %v1348_v56 = vmul.f32 %v2548_v45, %v1345_v55 }
 0x297   : > { %v1350_v60 = vadd.f32 %v1348_v56, %v1347_v54  ;;  %v1361_v61 = vmul.f32 %v1348_v56, %v1345_v55 }
 0x299   : > { %v1352_v63 = vadd.f32 %v1351_v62, %v1350_v60  ;;  %v1363_v1 = vadd.f32 %v1361_v61, %v1360_v59 }
 0x29b   : > { %v1353_v4 = vrot.slane %v1352_v63, 4  ;;  %v1365_v5 = vadd.f32 %v1364_v2, %v1363_v1 }
 0x29d   : > { %v1354_v6 = vadd.f32 %v1353_v4, %v1352_v63  ;;  %v1366_v7 = vrot.slane %v1365_v5, 4 }
 0x29f   : > { %v1355_v8 = vrot.slane %v1354_v6, 2  ;;  %v1367_v9 = vadd.f32 %v1366_v7, %v1365_v5 }
 0x2a1   : > { %v1356_v10 = vadd.f32 %v1355_v8, %v1354_v6  ;;  %v1368_v11 = vrot.slane %v1367_v9, 2 }
 0x2a3   : > { %v1357_v12 = vrot.slane %v1356_v10, 1  ;;  %v1369_v13 = vadd.f32 %v1368_v11, %v1367_v9 }
 0x2a5   : > { %v1358_v14 = vadd.f32 %v1357_v12, %v1356_v10  ;;  %v1370_v15 = vrot.slane %v1369_v13, 1 }
 0x2a7   : > { %v1359_v17 = vmul.f32 0.0625, %v1358_v14  ;;  %v1371_v18 = vadd.f32 %v1370_v15, %v1369_v13 }
 0x2a9   : > { %v1372_v19 = vmul.f32 0.0625, %v1371_v18  ;;  %v1373_v20 = vmul.f32 %v1359_v17, %v1359_v17  ;;  %v1380_v35 = vsub.f32 %v1344_v47, %v1359_v17  ;;  %v1381_v36 = vsub.f32 %v1345_v55, %v1359_v17 }
 0x2aa   : > { %v1382_v37 = vsub.f32 %v1346_v43, %v1359_v17 }
 0x2ab   : > { %v1374_v21 = vsub.f32 %v1372_v19, %v1373_v20 }
 0x2ad   : > { %v1375_v22 = vmax.f32 %v1374_v21, 0.0 }
 0x2af   : > { %v1376_v23 = vadd.f32 1e-05, %v1375_v22 }
 0x2b1   : > { %2151 = vrsqrt.f32 %v1376_v23 }
 0x2be   : > { %v2152_v31 = vpop.eup %2151 }
 0x2bf   : > { %v1379_v3 = vmul.f32 %v2152_v31, %v1378_v30 }
 0x2c1   : > { %v1386_v38 = vrot.slane %v1379_v3, %v877_v16 }
 0x2c3   : > { %v1387_v42 = vmul.f32 %v1386_v38, %v1380_v35  ;;  %v1388_v46 = vmul.f32 %v1386_v38, %v1381_v36  ;;  %v1389_v48 = vmul.f32 %v1386_v38, %v1382_v37 }
 0x2c5   : > { %v1397_v51 = vadd.f32 %v1841_v40, %v1387_v42  ;;  %v1398_v53 = vadd.f32 %v1841_v40, %v1388_v46  ;;  %v1399_v47 = vadd.f32 %v1841_v40, %v1389_v48 }
 0x2c7   : > { %v1418_v54 = vadd.f32 %v1412_v49, %v1397_v51  ;;  %v1419_v43 = vadd.f32 %v1414_v50, %v1398_v53  ;;  %v1420_v55 = vadd.f32 %v1413_v34, %v1399_v47 }
 0x2c9   : > { %v1421_v56 = vmax.f32 %v1418_v54, 0.0  ;;  %v1422_v16 = vmax.f32 %v1419_v43, 0.0  ;;  %v1423_v57 = vmax.f32 %v1420_v55, 0.0 }
 0x2cb   : > { %v1424_v59 = vmul.f32 %v2545_v41, %v1421_v56  ;;  %v1425_v60 = vmul.f32 %v2548_v45, %v1422_v16  ;;  %v1426_v61 = vmul.f32 %v2543_v39, %v1423_v57  ;;  %v1468_v45 = vld [vmem:[#allocation2 + $0x8] sm:$0x3] }
 0x2cd   : > { %v1851_v62 = vpack.c.bf16 %v1424_v59, %v1424_v59  ;;  %v1852_v63 = vpack.c.bf16 %v1425_v60, %v1425_v60  ;;  %v1853_v1 = vpack.c.bf16 %v1426_v61, %v1426_v61 }
 0x2cf   : > { %v1438_v2 = vshrl.u32 %v1851_v62, 16  ;;  %v1446_v4 = vshrl.u32 %v1852_v63, 16  ;;  %v1455_v5 = vshrl.u32 %v1853_v1, 16  ;;  %v1441_v7 = vshll.u32 %v1851_v62, 16 }
 0x2d0   : > { %v1449_v9 = vshll.u32 %v1852_v63, 16  ;;  %v1458_v11 = vshll.u32 %v1853_v1, 16 }
 0x2d1   : > { %v1440_v6 = vrot.slane %v1438_v2, 7  ;;  %v1448_v8 = vrot.slane %v1446_v4, 7  ;;  %v1457_v10 = vrot.slane %v1455_v5, 7 }
 0x2d3   : > { %v1443_v12 = vor.u32 %v1441_v7, %v1440_v6  ;;  %v1444_v13 = vrot.slane %v1440_v6, 4  ;;  %v1451_v14 = vor.u32 %v1449_v9, %v1448_v8  ;;  %v1453_v41 = vrot.slane %v1448_v8, 4 }
 0x2d4   : > { %v1460_v15 = vor.u32 %v1458_v11, %v1457_v10  ;;  %1474 = sbr.rel (%p1845_p1) target bundleno = 764 (0x2fc), region = 64 }
 0x2d5   : > { %v1452_v39 = vsel %vm2571_vm10, %v1444_v13, %v1451_v14  ;;  %v1465_v17 = vsel %vm2575_vm11, %v1443_v12, %v1400_v24 }
 0x2d6   : > { %v1461_v18 = vsel %vm2571_vm10, %v1453_v41, %v1460_v15  ;;  %1466 = vst [vmem:[#allocation2] sm:$0xf] %v1465_v17  ;;  %1467 = vst [vmem:[#allocation2 + $0x4] sm:$0xf] %v1452_v39 }
 0x2d7   : > { %v1469_v19 = vsel %vm2581_vm3, %v1461_v18, %v1468_v45 }
 0x2d8   : > { %1470 = vst [vmem:[#allocation2 + $0x8] sm:$0x3] %v1469_v19 }
 0x2d9   : > { %v1479_v20 = vrot.slane %v1424_v59, 7  ;;  %v1480_v21 = vrot.slane %v1425_v60, 7  ;;  %v1482_v22 = vrot.slane %v1426_v61, 7  ;;  %v2254_v24 = vmov 1983009808  }
 0x2da   : > { %v1493_v25 = vunpack.c.l.s4 %v2254_v24  ;;  %vm1487_vm0 = vcmask 1042432  }
 0x2db   : > { %v1481_v23 = vsel %vm895_vm2, %v1479_v20, %v1480_v21  ;;  %v1486_v52 = vsel %vm895_vm2, 0.0, %v1479_v20  ;;  %v1483_v44 = vsel %vm895_vm2, %v1480_v21, %v1482_v22 }
 0x2dc   : > { %v1491_v26 = vcombine.high %v1486_v52, %v1486_v52  ;;  %v1494_v27 = vunpack.c.0.s8 %v1493_v25  ;;  %v1508_v58 = vcombine.high %v1481_v23, %v1481_v23  ;;  %v1488_v28 = vsel %vm1487_vm0, %v1483_v44, 0.0 }
 0x2de   : > { %v1497_v29 = vsub.s32 %v1494_v27, %v2521_v0 }
 0x2e0   : > { %v1498_v30 = vrot.slane %v1486_v52, %v1497_v29  ;;  %v1505_v31 = vrot.slane %v1491_v26, %v1497_v29  ;;  %v1515_v3 = vrot.slane %v1481_v23, %v1497_v29  ;;  %v1522_v32 = vrot.slane %v1508_v58, %v1497_v29 }
 0x2e1   : > { %v1531_v33 = vrot.slane %v1488_v28, %v1497_v29 }
 0x2e2   : > { %v1506_v34 = vcombine.high %v1498_v30, %v1498_v30  ;;  %v1507_v35 = vcombine.high %v1505_v31, %v1505_v31  ;;  %v1523_v36 = vcombine.high %v1515_v3, %v1515_v3  ;;  %v1524_v37 = vcombine.high %v1522_v32, %v1522_v32 }
 0x2e3   : > { %v1532_v38 = vcombine.high %v1531_v33, %v1531_v33  ;;  %v1556_v40 = vrot.slane %v1515_v3, %v1497_v29 }
 0x2e4   : > { %v1533_v42 = vcombine.low %v1498_v30, %v1506_v34  ;;  %v1534_v46 = vcombine.low %v1505_v31, %v1507_v35  ;;  %v1557_v48 = vcombine.low %v1523_v36, %v1522_v32  ;;  %v1558_v49 = vcombine.low %v1524_v37, %v1531_v33 }
 0x2e5   : > { %v1580_v50 = vrot.slane %v1532_v38, %v1497_v29  ;;  %v1585_v54 = vsel %vm842_vm5, %v1556_v40, 0.0 }
 0x2e6   : > { %v1541_v51 = vrot.slane %v1533_v42, %v1497_v29  ;;  %v1548_v53 = vrot.slane %v1534_v46, %v1497_v29  ;;  %v1565_v47 = vrot.slane %v1557_v48, %v1497_v29  ;;  %v1572_v0 = vrot.slane %v1558_v49, %v1497_v29 }
 0x2e7   : > { %v1593_v43 = vsel %vm842_vm5, %v1580_v50, 0.0 }
 0x2e8   : > { %v1549_v55 = vcombine.low %v1541_v51, %v1548_v53  ;;  %v1573_v56 = vcombine.low %v1565_v47, %v1572_v0 }
 0x2ea   : > { %v1586_v16 = vadd.f32 %v1585_v54, %v1549_v55  ;;  %v1594_v57 = vadd.f32 %v1593_v43, %v1573_v56 }
 0x2ec   : > { %v1587_v59 = vrot.slane %v1586_v16, 4  ;;  %v1595_v60 = vrot.slane %v1594_v57, 4 }
 0x2ee   : > { %v1588_v61 = vadd.f32 %v1587_v59, %v1586_v16  ;;  %v1596_v62 = vadd.f32 %v1595_v60, %v1594_v57 }
 0x2f0   : > { %v1589_v63 = vrot.slane %v1588_v61, 2  ;;  %v1597_v1 = vrot.slane %v1596_v62, 2 }
 0x2f2   : > { %v1590_v2 = vadd.f32 %v1589_v63, %v1588_v61  ;;  %v1598_v4 = vadd.f32 %v1597_v1, %v1596_v62 }
 0x2f4   : > { %v1591_v5 = vrot.slane %v1590_v2, 1  ;;  %v1599_v6 = vrot.slane %v1598_v4, 1 }
 0x2f6   : > { %v1592_v7 = vadd.f32 %v1591_v5, %v1590_v2  ;;  %v1600_v8 = vadd.f32 %v1599_v6, %v1598_v4 }
 0x2f8   : > { %v1601_v9 = vmul.f32 0.125, %v1592_v7  ;;  %v1602_v10 = vmul.f32 0.125, %v1600_v8 }
 0x2fa   : > { %v1606_v11 = vsel %vm957_vm12, %v1602_v10, %v1601_v9 }
 0x2fb   : > { %1608 = vst [vmem:[%s2665_s7] sm:$0x3] %v1606_v11 }
 0x2fc PF: > { %p20_p4 = scmp.ge.s32.totalorder %s2317_s29, 4   ;;  %s2678_s24 = smov %s2239_s25 }
 0x2fd   : > { %s2679_s25 = smov %s2243_s26  ;;  %s2680_s26 = smov %s2327_s9 }
 0x2fe   : > { %s2681_s27 = smov %s2317_s29  ;;  %22 = sbr.rel (!%p20_p4) target bundleno = 5 (0x5), region = 121 }
 0x303   :  { %1620 = vsyncpa [#allocation5], 1 }
 0x304   :  { %1622 = vsyncpa [#allocation5 + $0x1], 1 }
 0x305   :  { %1623 = vsyncpa [#allocation7], 1 }
 0x306   :  { %1625 = vsyncpa [#allocation7 + $0x1], 1 }

</bundles_post_ra>
